<compile_context>
chip_gen: v5e
topology: v5e:2x2
jax: 0.10.0
libtpu: 0.0.40
codegen_flags: <defaults>
</compile_context>

<pallas_src>
import functools

import jax
import jax.numpy as jnp
from jax.experimental import pallas as pl
from jax.experimental.pallas import tpu as pltpu


PER_LAYER_REFS = 12  # wqkv, bqkv, wo, bo, g1, be1, w1, b1, w2, b2, g2, be2


# ----------------------------- Pallas kernel -------------------------------


def _layernorm(y, gamma, beta, eps=1e-5):
    mu = jnp.mean(y, axis=-1, keepdims=True)
    var = jnp.mean((y - mu) ** 2, axis=-1, keepdims=True)
    return (y - mu) * jax.lax.rsqrt(var + eps) * gamma + beta


def fused_model_kernel(x_ref, *refs, n_heads, batch):
    """Entire forward pass in one kernel.

    x_ref : (B*S, D) token + positional embeddings (batch folded into rows).
    refs  : n_layers * PER_LAYER_REFS layer-weight refs,
            then merged head weight (D, V_pad), head bias (1, V_pad),
            then the output ref (B*S, V_pad).
    """
    o_ref = refs[-1]
    w_head_ref = refs[-3]
    b_head_ref = refs[-2]
    layer_refs = refs[:-3]
    n_layers = len(layer_refs) // PER_LAYER_REFS

    x = x_ref[...]                                   # (BS, D) f32
    bs, d_model = x.shape
    seq = bs // batch
    d_head = d_model // n_heads
    scale = 1.0 / float(d_head) ** 0.5

    for layer in range(n_layers):                    # static unroll over layers
        (wqkv_ref, bqkv_ref, wo_ref, bo_ref,
         g1_ref, be1_ref, w1_ref, b1_ref, w2_ref, b2_ref,
         g2_ref, be2_ref) = layer_refs[layer * PER_LAYER_REFS:
                                       (layer + 1) * PER_LAYER_REFS]

        # Fused QKV projection: one (BS, D) @ (D, 3D) matmul.
        qkv = jnp.dot(x, wqkv_ref[...], preferred_element_type=jnp.float32) + bqkv_ref[...]
        q = qkv[:, :d_model].reshape(batch, seq, d_model)
        k = qkv[:, d_model:2 * d_model].reshape(batch, seq, d_model)
        v = qkv[:, 2 * d_model:].reshape(batch, seq, d_model)

        # Multi-head attention: batch-batched einsums per head; the output
        # projection is folded into the loop (sum_h o_h @ Wo[h*dh:(h+1)*dh]),
        # which is mathematically identical to concat(heads) @ Wo and avoids
        # the lane-axis concatenation entirely.
        attn = jnp.zeros((bs, d_model), jnp.float32)
        for h in range(n_heads):                     # static unroll over heads
            sl = slice(h * d_head, (h + 1) * d_head)
            qh, kh, vh = q[:, :, sl], k[:, :, sl], v[:, :, sl]
            s = jnp.einsum("bsd,btd->bst", qh, kh,
                           preferred_element_type=jnp.float32) * scale
            s = s - jnp.max(s, axis=-1, keepdims=True)
            p = jnp.exp(s)
            p = p * pl.reciprocal(jnp.sum(p, axis=-1, keepdims=True), approx=True)
            oh = jnp.einsum("bst,btd->bsd", p, vh,
                            preferred_element_type=jnp.float32)          # (B, S, dh)
            attn = attn + jnp.dot(oh.reshape(bs, d_head), wo_ref[sl, :],
                                  preferred_element_type=jnp.float32)
        attn = attn + bo_ref[...]

        # residual + LayerNorm 1
        h1 = _layernorm(x + attn, g1_ref[...], be1_ref[...])

        # FeedForward: Linear -> ReLU -> Linear
        f = jnp.dot(h1, w1_ref[...], preferred_element_type=jnp.float32) + b1_ref[...]
        f = jnp.maximum(f, 0.0)
        f = jnp.dot(f, w2_ref[...], preferred_element_type=jnp.float32) + b2_ref[...]

        # residual + LayerNorm 2
        x = _layernorm(h1 + f, g2_ref[...], be2_ref[...])

    # Merged LoRA head: x @ (W + (alpha/r)*A@B) + b, vocab padded to 128 lanes
    # so the only store to HBM is a lane-dense (BS, 128) slab.
    o_ref[...] = (jnp.dot(x, w_head_ref[...], preferred_element_type=jnp.float32)
                  + b_head_ref[...])


# ------------------------------ JAX wrappers --------------------------------


def prepare_fused_weights(params, lora_scaling):
    """One-time weight packing: fuse Q/K/V, merge LoRA into the head, pad vocab."""
    flat = []
    for bp in params["blocks"]:
        wqkv = jnp.concatenate([bp["wq"], bp["wk"], bp["wv"]], axis=1)
        bqkv = jnp.concatenate([bp["bq"], bp["bk"], bp["bv"]], axis=1)
        flat += [wqkv, bqkv, bp["wo"], bp["bo"],
                 bp["g1"], bp["be1"], bp["w1"], bp["b1"], bp["w2"], bp["b2"],
                 bp["g2"], bp["be2"]]

    lora = params["lora"]
    d_model, vocab = lora["w"].shape
    # Eval-mode LoRA merge: x@W + b + s*(x@A)@B == x@(W + s*A@B) + b (exact math).
    w_eff = lora["w"] + lora_scaling * jnp.dot(lora["a"], lora["bmat"])
    v_pad = max(128, ((vocab + 127) // 128) * 128)
    w_pad = jnp.zeros((d_model, v_pad), jnp.float32).at[:, :vocab].set(w_eff)
    b_pad = jnp.zeros((1, v_pad), jnp.float32).at[:, :vocab].set(lora["b"])
    return tuple(flat), w_pad, b_pad, vocab


def simple_language_model_forward(tokens, params, fused, n_heads):
    layer_weights, w_head, b_head, vocab = fused
    B, S = tokens.shape
    D = params["embedding"].shape[1]

    # Glue: embedding gathers stay in plain JAX (no hot-path compute).
    x = params["embedding"][tokens] + params["pos_encoding"][jnp.arange(S)][None, :, :]
    x_flat = x.reshape(B * S, D).astype(jnp.float32)

    v_pad = w_head.shape[1]
    n_inputs = 1 + len(layer_weights) + 2
    vmem_spec = pl.BlockSpec(memory_space=pltpu.MemorySpace.VMEM)

    logits_pad = pl.pallas_call(
        functools.partial(fused_model_kernel, n_heads=n_heads, batch=B),
        out_shape=jax.ShapeDtypeStruct((B * S, v_pad), jnp.float32),
        in_specs=[vmem_spec] * n_inputs,
        out_specs=vmem_spec,
    )(x_flat, *layer_weights, w_head, b_head)

    return logits_pad[:, :vocab].reshape(B, S, vocab)


# ---------------------------- Model construction ----------------------------


def init_params(key, vocab_size, d_model, n_heads, n_layers, d_ff, max_seq_len, lora_rank):
    keys = jax.random.split(key, 4 + n_layers)

    def lin(k, fan_in, fan_out):
        kw, kb = jax.random.split(k)
        w = jax.random.normal(kw, (fan_in, fan_out), jnp.float32) * 0.02
        b = jax.random.normal(kb, (1, fan_out), jnp.float32) * 0.02
        return w, b

    params = {
        "embedding": jax.random.normal(keys[0], (vocab_size, d_model), jnp.float32) * 0.02,
        "pos_encoding": jax.random.normal(keys[1], (max_seq_len, d_model), jnp.float32) * 0.02,
        "blocks": [],
    }

    for i in range(n_layers):
        k = jax.random.split(keys[4 + i], 6)
        wq, bq = lin(k[0], d_model, d_model)
        wk, bk = lin(k[1], d_model, d_model)
        wv, bv = lin(k[2], d_model, d_model)
        wo, bo = lin(k[3], d_model, d_model)
        w1, b1 = lin(k[4], d_model, d_ff)
        w2, b2 = lin(k[5], d_ff, d_model)
        params["blocks"].append({
            "wq": wq, "bq": bq, "wk": wk, "bk": bk, "wv": wv, "bv": bv,
            "wo": wo, "bo": bo,
            "g1": jnp.ones((1, d_model), jnp.float32), "be1": jnp.zeros((1, d_model), jnp.float32),
            "w1": w1, "b1": b1, "w2": w2, "b2": b2,
            "g2": jnp.ones((1, d_model), jnp.float32), "be2": jnp.zeros((1, d_model), jnp.float32),
        })

    kw, ka, kb2 = jax.random.split(keys[2], 3)
    w, b = lin(kw, d_model, vocab_size)
    params["lora"] = {
        "w": w, "b": b,
        "a": jax.random.normal(ka, (d_model, lora_rank), jnp.float32) * 0.02,
        "bmat": jax.random.normal(kb2, (lora_rank, vocab_size), jnp.float32) * 0.02,
    }
    return params


# ---------------------------------- main -------------------------------------

if __name__ == "__main__":
    vocab_size = 64
    d_model = 32
    n_heads = 4
    n_layers = 2
    d_ff = 64
    max_seq_len = 16
    lora_rank = 8
    lora_alpha = 16
    lora_scaling = float(lora_alpha) / float(lora_rank)

    batch, seq = 2, 8

    key = jax.random.PRNGKey(0)
    kp, kt = jax.random.split(key)
    params = init_params(kp, vocab_size, d_model, n_heads, n_layers, d_ff,
                         max_seq_len, lora_rank)
    fused = prepare_fused_weights(params, lora_scaling)
    tokens = jax.random.randint(kt, (batch, seq), 0, vocab_size, dtype=jnp.int32)

    logits = simple_language_model_forward(tokens, params, fused, n_heads)
    jax.block_until_ready(logits)

    assert logits.shape == (batch, seq, vocab_size), logits.shape
    assert logits.dtype == jnp.float32
    assert bool(jnp.all(jnp.isfinite(logits)))
    print("KERNEL_OK")
</pallas_src>

<mosaic_0001>
module attributes {stable_mosaic.version = 11 : i64} {
  func.func @fused_model_kernel(%arg0: memref<16x32xf32, #tpu.memory_space<vmem>>, %arg1: memref<32x96xf32, #tpu.memory_space<vmem>>, %arg2: memref<1x96xf32, #tpu.memory_space<vmem>>, %arg3: memref<32x32xf32, #tpu.memory_space<vmem>>, %arg4: memref<1x32xf32, #tpu.memory_space<vmem>>, %arg5: memref<1x32xf32, #tpu.memory_space<vmem>>, %arg6: memref<1x32xf32, #tpu.memory_space<vmem>>, %arg7: memref<32x64xf32, #tpu.memory_space<vmem>>, %arg8: memref<1x64xf32, #tpu.memory_space<vmem>>, %arg9: memref<64x32xf32, #tpu.memory_space<vmem>>, %arg10: memref<1x32xf32, #tpu.memory_space<vmem>>, %arg11: memref<1x32xf32, #tpu.memory_space<vmem>>, %arg12: memref<1x32xf32, #tpu.memory_space<vmem>>, %arg13: memref<32x96xf32, #tpu.memory_space<vmem>>, %arg14: memref<1x96xf32, #tpu.memory_space<vmem>>, %arg15: memref<32x32xf32, #tpu.memory_space<vmem>>, %arg16: memref<1x32xf32, #tpu.memory_space<vmem>>, %arg17: memref<1x32xf32, #tpu.memory_space<vmem>>, %arg18: memref<1x32xf32, #tpu.memory_space<vmem>>, %arg19: memref<32x64xf32, #tpu.memory_space<vmem>>, %arg20: memref<1x64xf32, #tpu.memory_space<vmem>>, %arg21: memref<64x32xf32, #tpu.memory_space<vmem>>, %arg22: memref<1x32xf32, #tpu.memory_space<vmem>>, %arg23: memref<1x32xf32, #tpu.memory_space<vmem>>, %arg24: memref<1x32xf32, #tpu.memory_space<vmem>>, %arg25: memref<32x128xf32, #tpu.memory_space<vmem>>, %arg26: memref<1x128xf32, #tpu.memory_space<vmem>>, %arg27: memref<16x128xf32, #tpu.memory_space<vmem>>) attributes {dimension_semantics = [], scalar_prefetch = 0 : i64, scratch_operands = 0 : i64, tpu.core_type = #tpu.core_type<tc>} {
    %c0 = arith.constant 0 : index
    %c0_0 = arith.constant 0 : index
    %0 = vector.load %arg0[%c0, %c0_0] : memref<16x32xf32, #tpu.memory_space<vmem>>, vector<16x32xf32>
    %c0_1 = arith.constant 0 : index
    %c0_2 = arith.constant 0 : index
    %1 = vector.load %arg1[%c0_1, %c0_2] : memref<32x96xf32, #tpu.memory_space<vmem>>, vector<32x96xf32>
    %cst = arith.constant dense<0.000000e+00> : vector<16x96xf32>
    %2 = tpu.matmul %0, %1, %cst {dimension_numbers = #tpu.dot_dimension_numbers<[1], [0], [0], [1], [0, 0, 1, 1], [], []>} : vector<16x32xf32>, vector<32x96xf32>, vector<16x96xf32> -> vector<16x96xf32>
    %c0_3 = arith.constant 0 : index
    %c0_4 = arith.constant 0 : index
    %3 = vector.load %arg2[%c0_3, %c0_4] : memref<1x96xf32, #tpu.memory_space<vmem>>, vector<1x96xf32>
    %4 = vector.broadcast %3 : vector<1x96xf32> to vector<16x96xf32>
    %5 = arith.addf %2, %4 : vector<16x96xf32>
    %6 = vector.extract_strided_slice %5 {offsets = [0, 0], sizes = [16, 32], strides = [1, 1]} : vector<16x96xf32> to vector<16x32xf32>
    %7 = vector.shape_cast %6 : vector<16x32xf32> to vector<2x8x32xf32>
    %8 = vector.extract_strided_slice %5 {offsets = [0, 32], sizes = [16, 32], strides = [1, 1]} : vector<16x96xf32> to vector<16x32xf32>
    %9 = vector.shape_cast %8 : vector<16x32xf32> to vector<2x8x32xf32>
    %10 = vector.extract_strided_slice %5 {offsets = [0, 64], sizes = [16, 32], strides = [1, 1]} : vector<16x96xf32> to vector<16x32xf32>
    %11 = vector.shape_cast %10 : vector<16x32xf32> to vector<2x8x32xf32>
    %cst_5 = arith.constant 0.000000e+00 : f32
    %12 = vector.broadcast %cst_5 : f32 to vector<16x32xf32>
    %13 = vector.extract_strided_slice %7 {offsets = [0, 0, 0], sizes = [2, 8, 8], strides = [1, 1, 1]} : vector<2x8x32xf32> to vector<2x8x8xf32>
    %14 = vector.extract_strided_slice %9 {offsets = [0, 0, 0], sizes = [2, 8, 8], strides = [1, 1, 1]} : vector<2x8x32xf32> to vector<2x8x8xf32>
    %15 = vector.extract_strided_slice %11 {offsets = [0, 0, 0], sizes = [2, 8, 8], strides = [1, 1, 1]} : vector<2x8x32xf32> to vector<2x8x8xf32>
    "tpu.trace_start"() <{level = 10 : i32, message = "bsd,btd->bst"}> : () -> ()
    %cst_6 = arith.constant dense<0.000000e+00> : vector<2x8x8xf32>
    %16 = tpu.matmul %13, %14, %cst_6 {dimension_numbers = #tpu.dot_dimension_numbers<[2], [2], [1], [1], [0, 0, 0, 1, 1, 1], [0], [0]>} : vector<2x8x8xf32>, vector<2x8x8xf32>, vector<2x8x8xf32> -> vector<2x8x8xf32>
    "tpu.trace_stop"() : () -> ()
    %cst_7 = arith.constant 0.353553385 : f32
    %17 = vector.broadcast %cst_7 : f32 to vector<2x8x8xf32>
    %18 = arith.mulf %16, %17 : vector<2x8x8xf32>
    %cst_8 = arith.constant dense<0xFF800000> : vector<2x8xf32>
    %19 = vector.multi_reduction <maximumf>, %18, %cst_8 [2] : vector<2x8x8xf32> to vector<2x8xf32>
    %20 = vector.shape_cast %19 : vector<2x8xf32> to vector<2x8x1xf32>
    %21 = vector.broadcast %20 : vector<2x8x1xf32> to vector<2x8x8xf32>
    %22 = arith.subf %18, %21 : vector<2x8x8xf32>
    %23 = math.exp %22 : vector<2x8x8xf32>
    %cst_9 = arith.constant dense<0.000000e+00> : vector<2x8xf32>
    %24 = vector.multi_reduction <add>, %23, %cst_9 [2] : vector<2x8x8xf32> to vector<2x8xf32>
    %25 = vector.shape_cast %24 : vector<2x8xf32> to vector<2x8x1xf32>
    %26 = tpu.reciprocal %25 {approx = true} : vector<2x8x1xf32> -> vector<2x8x1xf32>
    %27 = vector.broadcast %26 : vector<2x8x1xf32> to vector<2x8x8xf32>
    %28 = arith.mulf %23, %27 : vector<2x8x8xf32>
    "tpu.trace_start"() <{level = 10 : i32, message = "bst,btd->bsd"}> : () -> ()
    %cst_10 = arith.constant dense<0.000000e+00> : vector<2x8x8xf32>
    %29 = tpu.matmul %28, %15, %cst_10 {dimension_numbers = #tpu.dot_dimension_numbers<[2], [1], [1], [2], [0, 0, 0, 1, 1, 2], [0], [0]>} : vector<2x8x8xf32>, vector<2x8x8xf32>, vector<2x8x8xf32> -> vector<2x8x8xf32>
    "tpu.trace_stop"() : () -> ()
    %30 = vector.shape_cast %29 : vector<2x8x8xf32> to vector<16x8xf32>
    %c0_11 = arith.constant 0 : index
    %c0_12 = arith.constant 0 : index
    %31 = vector.load %arg3[%c0_11, %c0_12] : memref<32x32xf32, #tpu.memory_space<vmem>>, vector<8x32xf32>
    %cst_13 = arith.constant dense<0.000000e+00> : vector<16x32xf32>
    %32 = tpu.matmul %30, %31, %cst_13 {dimension_numbers = #tpu.dot_dimension_numbers<[1], [0], [0], [1], [0, 0, 1, 1], [], []>} : vector<16x8xf32>, vector<8x32xf32>, vector<16x32xf32> -> vector<16x32xf32>
    %33 = arith.addf %12, %32 : vector<16x32xf32>
    %34 = vector.extract_strided_slice %7 {offsets = [0, 0, 8], sizes = [2, 8, 8], strides = [1, 1, 1]} : vector<2x8x32xf32> to vector<2x8x8xf32>
    %35 = vector.extract_strided_slice %9 {offsets = [0, 0, 8], sizes = [2, 8, 8], strides = [1, 1, 1]} : vector<2x8x32xf32> to vector<2x8x8xf32>
    %36 = vector.extract_strided_slice %11 {offsets = [0, 0, 8], sizes = [2, 8, 8], strides = [1, 1, 1]} : vector<2x8x32xf32> to vector<2x8x8xf32>
    "tpu.trace_start"() <{level = 10 : i32, message = "bsd,btd->bst"}> : () -> ()
    %cst_14 = arith.constant dense<0.000000e+00> : vector<2x8x8xf32>
    %37 = tpu.matmul %34, %35, %cst_14 {dimension_numbers = #tpu.dot_dimension_numbers<[2], [2], [1], [1], [0, 0, 0, 1, 1, 1], [0], [0]>} : vector<2x8x8xf32>, vector<2x8x8xf32>, vector<2x8x8xf32> -> vector<2x8x8xf32>
    "tpu.trace_stop"() : () -> ()
    %cst_15 = arith.constant 0.353553385 : f32
    %38 = vector.broadcast %cst_15 : f32 to vector<2x8x8xf32>
    %39 = arith.mulf %37, %38 : vector<2x8x8xf32>
    %cst_16 = arith.constant dense<0xFF800000> : vector<2x8xf32>
    %40 = vector.multi_reduction <maximumf>, %39, %cst_16 [2] : vector<2x8x8xf32> to vector<2x8xf32>
    %41 = vector.shape_cast %40 : vector<2x8xf32> to vector<2x8x1xf32>
    %42 = vector.broadcast %41 : vector<2x8x1xf32> to vector<2x8x8xf32>
    %43 = arith.subf %39, %42 : vector<2x8x8xf32>
    %44 = math.exp %43 : vector<2x8x8xf32>
    %cst_17 = arith.constant dense<0.000000e+00> : vector<2x8xf32>
    %45 = vector.multi_reduction <add>, %44, %cst_17 [2] : vector<2x8x8xf32> to vector<2x8xf32>
    %46 = vector.shape_cast %45 : vector<2x8xf32> to vector<2x8x1xf32>
    %47 = tpu.reciprocal %46 {approx = true} : vector<2x8x1xf32> -> vector<2x8x1xf32>
    %48 = vector.broadcast %47 : vector<2x8x1xf32> to vector<2x8x8xf32>
    %49 = arith.mulf %44, %48 : vector<2x8x8xf32>
    "tpu.trace_start"() <{level = 10 : i32, message = "bst,btd->bsd"}> : () -> ()
    %cst_18 = arith.constant dense<0.000000e+00> : vector<2x8x8xf32>
    %50 = tpu.matmul %49, %36, %cst_18 {dimension_numbers = #tpu.dot_dimension_numbers<[2], [1], [1], [2], [0, 0, 0, 1, 1, 2], [0], [0]>} : vector<2x8x8xf32>, vector<2x8x8xf32>, vector<2x8x8xf32> -> vector<2x8x8xf32>
    "tpu.trace_stop"() : () -> ()
    %51 = vector.shape_cast %50 : vector<2x8x8xf32> to vector<16x8xf32>
    %c8 = arith.constant 8 : index
    %c0_19 = arith.constant 0 : index
    %52 = vector.load %arg3[%c8, %c0_19] : memref<32x32xf32, #tpu.memory_space<vmem>>, vector<8x32xf32>
    %cst_20 = arith.constant dense<0.000000e+00> : vector<16x32xf32>
    %53 = tpu.matmul %51, %52, %cst_20 {dimension_numbers = #tpu.dot_dimension_numbers<[1], [0], [0], [1], [0, 0, 1, 1], [], []>} : vector<16x8xf32>, vector<8x32xf32>, vector<16x32xf32> -> vector<16x32xf32>
    %54 = arith.addf %33, %53 : vector<16x32xf32>
    %55 = vector.extract_strided_slice %7 {offsets = [0, 0, 16], sizes = [2, 8, 8], strides = [1, 1, 1]} : vector<2x8x32xf32> to vector<2x8x8xf32>
    %56 = vector.extract_strided_slice %9 {offsets = [0, 0, 16], sizes = [2, 8, 8], strides = [1, 1, 1]} : vector<2x8x32xf32> to vector<2x8x8xf32>
    %57 = vector.extract_strided_slice %11 {offsets = [0, 0, 16], sizes = [2, 8, 8], strides = [1, 1, 1]} : vector<2x8x32xf32> to vector<2x8x8xf32>
    "tpu.trace_start"() <{level = 10 : i32, message = "bsd,btd->bst"}> : () -> ()
    %cst_21 = arith.constant dense<0.000000e+00> : vector<2x8x8xf32>
    %58 = tpu.matmul %55, %56, %cst_21 {dimension_numbers = #tpu.dot_dimension_numbers<[2], [2], [1], [1], [0, 0, 0, 1, 1, 1], [0], [0]>} : vector<2x8x8xf32>, vector<2x8x8xf32>, vector<2x8x8xf32> -> vector<2x8x8xf32>
    "tpu.trace_stop"() : () -> ()
    %cst_22 = arith.constant 0.353553385 : f32
    %59 = vector.broadcast %cst_22 : f32 to vector<2x8x8xf32>
    %60 = arith.mulf %58, %59 : vector<2x8x8xf32>
    %cst_23 = arith.constant dense<0xFF800000> : vector<2x8xf32>
    %61 = vector.multi_reduction <maximumf>, %60, %cst_23 [2] : vector<2x8x8xf32> to vector<2x8xf32>
    %62 = vector.shape_cast %61 : vector<2x8xf32> to vector<2x8x1xf32>
    %63 = vector.broadcast %62 : vector<2x8x1xf32> to vector<2x8x8xf32>
    %64 = arith.subf %60, %63 : vector<2x8x8xf32>
    %65 = math.exp %64 : vector<2x8x8xf32>
    %cst_24 = arith.constant dense<0.000000e+00> : vector<2x8xf32>
    %66 = vector.multi_reduction <add>, %65, %cst_24 [2] : vector<2x8x8xf32> to vector<2x8xf32>
    %67 = vector.shape_cast %66 : vector<2x8xf32> to vector<2x8x1xf32>
    %68 = tpu.reciprocal %67 {approx = true} : vector<2x8x1xf32> -> vector<2x8x1xf32>
    %69 = vector.broadcast %68 : vector<2x8x1xf32> to vector<2x8x8xf32>
    %70 = arith.mulf %65, %69 : vector<2x8x8xf32>
    "tpu.trace_start"() <{level = 10 : i32, message = "bst,btd->bsd"}> : () -> ()
    %cst_25 = arith.constant dense<0.000000e+00> : vector<2x8x8xf32>
    %71 = tpu.matmul %70, %57, %cst_25 {dimension_numbers = #tpu.dot_dimension_numbers<[2], [1], [1], [2], [0, 0, 0, 1, 1, 2], [0], [0]>} : vector<2x8x8xf32>, vector<2x8x8xf32>, vector<2x8x8xf32> -> vector<2x8x8xf32>
    "tpu.trace_stop"() : () -> ()
    %72 = vector.shape_cast %71 : vector<2x8x8xf32> to vector<16x8xf32>
    %c16 = arith.constant 16 : index
    %c0_26 = arith.constant 0 : index
    %73 = vector.load %arg3[%c16, %c0_26] : memref<32x32xf32, #tpu.memory_space<vmem>>, vector<8x32xf32>
    %cst_27 = arith.constant dense<0.000000e+00> : vector<16x32xf32>
    %74 = tpu.matmul %72, %73, %cst_27 {dimension_numbers = #tpu.dot_dimension_numbers<[1], [0], [0], [1], [0, 0, 1, 1], [], []>} : vector<16x8xf32>, vector<8x32xf32>, vector<16x32xf32> -> vector<16x32xf32>
    %75 = arith.addf %54, %74 : vector<16x32xf32>
    %76 = vector.extract_strided_slice %7 {offsets = [0, 0, 24], sizes = [2, 8, 8], strides = [1, 1, 1]} : vector<2x8x32xf32> to vector<2x8x8xf32>
    %77 = vector.extract_strided_slice %9 {offsets = [0, 0, 24], sizes = [2, 8, 8], strides = [1, 1, 1]} : vector<2x8x32xf32> to vector<2x8x8xf32>
    %78 = vector.extract_strided_slice %11 {offsets = [0, 0, 24], sizes = [2, 8, 8], strides = [1, 1, 1]} : vector<2x8x32xf32> to vector<2x8x8xf32>
    "tpu.trace_start"() <{level = 10 : i32, message = "bsd,btd->bst"}> : () -> ()
    %cst_28 = arith.constant dense<0.000000e+00> : vector<2x8x8xf32>
    %79 = tpu.matmul %76, %77, %cst_28 {dimension_numbers = #tpu.dot_dimension_numbers<[2], [2], [1], [1], [0, 0, 0, 1, 1, 1], [0], [0]>} : vector<2x8x8xf32>, vector<2x8x8xf32>, vector<2x8x8xf32> -> vector<2x8x8xf32>
    "tpu.trace_stop"() : () -> ()
    %cst_29 = arith.constant 0.353553385 : f32
    %80 = vector.broadcast %cst_29 : f32 to vector<2x8x8xf32>
    %81 = arith.mulf %79, %80 : vector<2x8x8xf32>
    %cst_30 = arith.constant dense<0xFF800000> : vector<2x8xf32>
    %82 = vector.multi_reduction <maximumf>, %81, %cst_30 [2] : vector<2x8x8xf32> to vector<2x8xf32>
    %83 = vector.shape_cast %82 : vector<2x8xf32> to vector<2x8x1xf32>
    %84 = vector.broadcast %83 : vector<2x8x1xf32> to vector<2x8x8xf32>
    %85 = arith.subf %81, %84 : vector<2x8x8xf32>
    %86 = math.exp %85 : vector<2x8x8xf32>
    %cst_31 = arith.constant dense<0.000000e+00> : vector<2x8xf32>
    %87 = vector.multi_reduction <add>, %86, %cst_31 [2] : vector<2x8x8xf32> to vector<2x8xf32>
    %88 = vector.shape_cast %87 : vector<2x8xf32> to vector<2x8x1xf32>
    %89 = tpu.reciprocal %88 {approx = true} : vector<2x8x1xf32> -> vector<2x8x1xf32>
    %90 = vector.broadcast %89 : vector<2x8x1xf32> to vector<2x8x8xf32>
    %91 = arith.mulf %86, %90 : vector<2x8x8xf32>
    "tpu.trace_start"() <{level = 10 : i32, message = "bst,btd->bsd"}> : () -> ()
    %cst_32 = arith.constant dense<0.000000e+00> : vector<2x8x8xf32>
    %92 = tpu.matmul %91, %78, %cst_32 {dimension_numbers = #tpu.dot_dimension_numbers<[2], [1], [1], [2], [0, 0, 0, 1, 1, 2], [0], [0]>} : vector<2x8x8xf32>, vector<2x8x8xf32>, vector<2x8x8xf32> -> vector<2x8x8xf32>
    "tpu.trace_stop"() : () -> ()
    %93 = vector.shape_cast %92 : vector<2x8x8xf32> to vector<16x8xf32>
    %c24 = arith.constant 24 : index
    %c0_33 = arith.constant 0 : index
    %94 = vector.load %arg3[%c24, %c0_33] : memref<32x32xf32, #tpu.memory_space<vmem>>, vector<8x32xf32>
    %cst_34 = arith.constant dense<0.000000e+00> : vector<16x32xf32>
    %95 = tpu.matmul %93, %94, %cst_34 {dimension_numbers = #tpu.dot_dimension_numbers<[1], [0], [0], [1], [0, 0, 1, 1], [], []>} : vector<16x8xf32>, vector<8x32xf32>, vector<16x32xf32> -> vector<16x32xf32>
    %96 = arith.addf %75, %95 : vector<16x32xf32>
    %c0_35 = arith.constant 0 : index
    %c0_36 = arith.constant 0 : index
    %97 = vector.load %arg4[%c0_35, %c0_36] : memref<1x32xf32, #tpu.memory_space<vmem>>, vector<1x32xf32>
    %98 = vector.broadcast %97 : vector<1x32xf32> to vector<16x32xf32>
    %99 = arith.addf %96, %98 : vector<16x32xf32>
    %100 = arith.addf %0, %99 : vector<16x32xf32>
    %c0_37 = arith.constant 0 : index
    %c0_38 = arith.constant 0 : index
    %101 = vector.load %arg5[%c0_37, %c0_38] : memref<1x32xf32, #tpu.memory_space<vmem>>, vector<1x32xf32>
    %c0_39 = arith.constant 0 : index
    %c0_40 = arith.constant 0 : index
    %102 = vector.load %arg6[%c0_39, %c0_40] : memref<1x32xf32, #tpu.memory_space<vmem>>, vector<1x32xf32>
    %cst_41 = arith.constant dense<0.000000e+00> : vector<16xf32>
    %103 = vector.multi_reduction <add>, %100, %cst_41 [1] : vector<16x32xf32> to vector<16xf32>
    %104 = vector.shape_cast %103 : vector<16xf32> to vector<16x1xf32>
    %cst_42 = arith.constant 3.200000e+01 : f32
    %105 = vector.broadcast %cst_42 : f32 to vector<16x1xf32>
    %106 = arith.divf %104, %105 : vector<16x1xf32>
    %107 = vector.broadcast %106 : vector<16x1xf32> to vector<16x32xf32>
    %108 = arith.subf %100, %107 : vector<16x32xf32>
    %109 = arith.mulf %108, %108 : vector<16x32xf32>
    %cst_43 = arith.constant dense<0.000000e+00> : vector<16xf32>
    %110 = vector.multi_reduction <add>, %109, %cst_43 [1] : vector<16x32xf32> to vector<16xf32>
    %111 = vector.shape_cast %110 : vector<16xf32> to vector<16x1xf32>
    %cst_44 = arith.constant 3.200000e+01 : f32
    %112 = vector.broadcast %cst_44 : f32 to vector<16x1xf32>
    %113 = arith.divf %111, %112 : vector<16x1xf32>
    %114 = vector.broadcast %106 : vector<16x1xf32> to vector<16x32xf32>
    %115 = arith.subf %100, %114 : vector<16x32xf32>
    %cst_45 = arith.constant 9.99999974E-6 : f32
    %116 = vector.broadcast %cst_45 : f32 to vector<16x1xf32>
    %117 = arith.addf %113, %116 : vector<16x1xf32>
    %118 = math.rsqrt %117 : vector<16x1xf32>
    %119 = vector.broadcast %118 : vector<16x1xf32> to vector<16x32xf32>
    %120 = arith.mulf %115, %119 : vector<16x32xf32>
    %121 = vector.broadcast %101 : vector<1x32xf32> to vector<16x32xf32>
    %122 = arith.mulf %120, %121 : vector<16x32xf32>
    %123 = vector.broadcast %102 : vector<1x32xf32> to vector<16x32xf32>
    %124 = arith.addf %122, %123 : vector<16x32xf32>
    %c0_46 = arith.constant 0 : index
    %c0_47 = arith.constant 0 : index
    %125 = vector.load %arg7[%c0_46, %c0_47] : memref<32x64xf32, #tpu.memory_space<vmem>>, vector<32x64xf32>
    %cst_48 = arith.constant dense<0.000000e+00> : vector<16x64xf32>
    %126 = tpu.matmul %124, %125, %cst_48 {dimension_numbers = #tpu.dot_dimension_numbers<[1], [0], [0], [1], [0, 0, 1, 1], [], []>} : vector<16x32xf32>, vector<32x64xf32>, vector<16x64xf32> -> vector<16x64xf32>
    %c0_49 = arith.constant 0 : index
    %c0_50 = arith.constant 0 : index
    %127 = vector.load %arg8[%c0_49, %c0_50] : memref<1x64xf32, #tpu.memory_space<vmem>>, vector<1x64xf32>
    %128 = vector.broadcast %127 : vector<1x64xf32> to vector<16x64xf32>
    %129 = arith.addf %126, %128 : vector<16x64xf32>
    %cst_51 = arith.constant 0.000000e+00 : f32
    %130 = vector.broadcast %cst_51 : f32 to vector<16x64xf32>
    %131 = arith.maximumf %129, %130 : vector<16x64xf32>
    %c0_52 = arith.constant 0 : index
    %c0_53 = arith.constant 0 : index
    %132 = vector.load %arg9[%c0_52, %c0_53] : memref<64x32xf32, #tpu.memory_space<vmem>>, vector<64x32xf32>
    %cst_54 = arith.constant dense<0.000000e+00> : vector<16x32xf32>
    %133 = tpu.matmul %131, %132, %cst_54 {dimension_numbers = #tpu.dot_dimension_numbers<[1], [0], [0], [1], [0, 0, 1, 1], [], []>} : vector<16x64xf32>, vector<64x32xf32>, vector<16x32xf32> -> vector<16x32xf32>
    %c0_55 = arith.constant 0 : index
    %c0_56 = arith.constant 0 : index
    %134 = vector.load %arg10[%c0_55, %c0_56] : memref<1x32xf32, #tpu.memory_space<vmem>>, vector<1x32xf32>
    %135 = vector.broadcast %134 : vector<1x32xf32> to vector<16x32xf32>
    %136 = arith.addf %133, %135 : vector<16x32xf32>
    %137 = arith.addf %124, %136 : vector<16x32xf32>
    %c0_57 = arith.constant 0 : index
    %c0_58 = arith.constant 0 : index
    %138 = vector.load %arg11[%c0_57, %c0_58] : memref<1x32xf32, #tpu.memory_space<vmem>>, vector<1x32xf32>
    %c0_59 = arith.constant 0 : index
    %c0_60 = arith.constant 0 : index
    %139 = vector.load %arg12[%c0_59, %c0_60] : memref<1x32xf32, #tpu.memory_space<vmem>>, vector<1x32xf32>
    %cst_61 = arith.constant dense<0.000000e+00> : vector<16xf32>
    %140 = vector.multi_reduction <add>, %137, %cst_61 [1] : vector<16x32xf32> to vector<16xf32>
    %141 = vector.shape_cast %140 : vector<16xf32> to vector<16x1xf32>
    %cst_62 = arith.constant 3.200000e+01 : f32
    %142 = vector.broadcast %cst_62 : f32 to vector<16x1xf32>
    %143 = arith.divf %141, %142 : vector<16x1xf32>
    %144 = vector.broadcast %143 : vector<16x1xf32> to vector<16x32xf32>
    %145 = arith.subf %137, %144 : vector<16x32xf32>
    %146 = arith.mulf %145, %145 : vector<16x32xf32>
    %cst_63 = arith.constant dense<0.000000e+00> : vector<16xf32>
    %147 = vector.multi_reduction <add>, %146, %cst_63 [1] : vector<16x32xf32> to vector<16xf32>
    %148 = vector.shape_cast %147 : vector<16xf32> to vector<16x1xf32>
    %cst_64 = arith.constant 3.200000e+01 : f32
    %149 = vector.broadcast %cst_64 : f32 to vector<16x1xf32>
    %150 = arith.divf %148, %149 : vector<16x1xf32>
    %151 = vector.broadcast %143 : vector<16x1xf32> to vector<16x32xf32>
    %152 = arith.subf %137, %151 : vector<16x32xf32>
    %cst_65 = arith.constant 9.99999974E-6 : f32
    %153 = vector.broadcast %cst_65 : f32 to vector<16x1xf32>
    %154 = arith.addf %150, %153 : vector<16x1xf32>
    %155 = math.rsqrt %154 : vector<16x1xf32>
    %156 = vector.broadcast %155 : vector<16x1xf32> to vector<16x32xf32>
    %157 = arith.mulf %152, %156 : vector<16x32xf32>
    %158 = vector.broadcast %138 : vector<1x32xf32> to vector<16x32xf32>
    %159 = arith.mulf %157, %158 : vector<16x32xf32>
    %160 = vector.broadcast %139 : vector<1x32xf32> to vector<16x32xf32>
    %161 = arith.addf %159, %160 : vector<16x32xf32>
    %c0_66 = arith.constant 0 : index
    %c0_67 = arith.constant 0 : index
    %162 = vector.load %arg13[%c0_66, %c0_67] : memref<32x96xf32, #tpu.memory_space<vmem>>, vector<32x96xf32>
    %cst_68 = arith.constant dense<0.000000e+00> : vector<16x96xf32>
    %163 = tpu.matmul %161, %162, %cst_68 {dimension_numbers = #tpu.dot_dimension_numbers<[1], [0], [0], [1], [0, 0, 1, 1], [], []>} : vector<16x32xf32>, vector<32x96xf32>, vector<16x96xf32> -> vector<16x96xf32>
    %c0_69 = arith.constant 0 : index
    %c0_70 = arith.constant 0 : index
    %164 = vector.load %arg14[%c0_69, %c0_70] : memref<1x96xf32, #tpu.memory_space<vmem>>, vector<1x96xf32>
    %165 = vector.broadcast %164 : vector<1x96xf32> to vector<16x96xf32>
    %166 = arith.addf %163, %165 : vector<16x96xf32>
    %167 = vector.extract_strided_slice %166 {offsets = [0, 0], sizes = [16, 32], strides = [1, 1]} : vector<16x96xf32> to vector<16x32xf32>
    %168 = vector.shape_cast %167 : vector<16x32xf32> to vector<2x8x32xf32>
    %169 = vector.extract_strided_slice %166 {offsets = [0, 32], sizes = [16, 32], strides = [1, 1]} : vector<16x96xf32> to vector<16x32xf32>
    %170 = vector.shape_cast %169 : vector<16x32xf32> to vector<2x8x32xf32>
    %171 = vector.extract_strided_slice %166 {offsets = [0, 64], sizes = [16, 32], strides = [1, 1]} : vector<16x96xf32> to vector<16x32xf32>
    %172 = vector.shape_cast %171 : vector<16x32xf32> to vector<2x8x32xf32>
    %cst_71 = arith.constant 0.000000e+00 : f32
    %173 = vector.broadcast %cst_71 : f32 to vector<16x32xf32>
    %174 = vector.extract_strided_slice %168 {offsets = [0, 0, 0], sizes = [2, 8, 8], strides = [1, 1, 1]} : vector<2x8x32xf32> to vector<2x8x8xf32>
    %175 = vector.extract_strided_slice %170 {offsets = [0, 0, 0], sizes = [2, 8, 8], strides = [1, 1, 1]} : vector<2x8x32xf32> to vector<2x8x8xf32>
    %176 = vector.extract_strided_slice %172 {offsets = [0, 0, 0], sizes = [2, 8, 8], strides = [1, 1, 1]} : vector<2x8x32xf32> to vector<2x8x8xf32>
    "tpu.trace_start"() <{level = 10 : i32, message = "bsd,btd->bst"}> : () -> ()
    %cst_72 = arith.constant dense<0.000000e+00> : vector<2x8x8xf32>
    %177 = tpu.matmul %174, %175, %cst_72 {dimension_numbers = #tpu.dot_dimension_numbers<[2], [2], [1], [1], [0, 0, 0, 1, 1, 1], [0], [0]>} : vector<2x8x8xf32>, vector<2x8x8xf32>, vector<2x8x8xf32> -> vector<2x8x8xf32>
    "tpu.trace_stop"() : () -> ()
    %cst_73 = arith.constant 0.353553385 : f32
    %178 = vector.broadcast %cst_73 : f32 to vector<2x8x8xf32>
    %179 = arith.mulf %177, %178 : vector<2x8x8xf32>
    %cst_74 = arith.constant dense<0xFF800000> : vector<2x8xf32>
    %180 = vector.multi_reduction <maximumf>, %179, %cst_74 [2] : vector<2x8x8xf32> to vector<2x8xf32>
    %181 = vector.shape_cast %180 : vector<2x8xf32> to vector<2x8x1xf32>
    %182 = vector.broadcast %181 : vector<2x8x1xf32> to vector<2x8x8xf32>
    %183 = arith.subf %179, %182 : vector<2x8x8xf32>
    %184 = math.exp %183 : vector<2x8x8xf32>
    %cst_75 = arith.constant dense<0.000000e+00> : vector<2x8xf32>
    %185 = vector.multi_reduction <add>, %184, %cst_75 [2] : vector<2x8x8xf32> to vector<2x8xf32>
    %186 = vector.shape_cast %185 : vector<2x8xf32> to vector<2x8x1xf32>
    %187 = tpu.reciprocal %186 {approx = true} : vector<2x8x1xf32> -> vector<2x8x1xf32>
    %188 = vector.broadcast %187 : vector<2x8x1xf32> to vector<2x8x8xf32>
    %189 = arith.mulf %184, %188 : vector<2x8x8xf32>
    "tpu.trace_start"() <{level = 10 : i32, message = "bst,btd->bsd"}> : () -> ()
    %cst_76 = arith.constant dense<0.000000e+00> : vector<2x8x8xf32>
    %190 = tpu.matmul %189, %176, %cst_76 {dimension_numbers = #tpu.dot_dimension_numbers<[2], [1], [1], [2], [0, 0, 0, 1, 1, 2], [0], [0]>} : vector<2x8x8xf32>, vector<2x8x8xf32>, vector<2x8x8xf32> -> vector<2x8x8xf32>
    "tpu.trace_stop"() : () -> ()
    %191 = vector.shape_cast %190 : vector<2x8x8xf32> to vector<16x8xf32>
    %c0_77 = arith.constant 0 : index
    %c0_78 = arith.constant 0 : index
    %192 = vector.load %arg15[%c0_77, %c0_78] : memref<32x32xf32, #tpu.memory_space<vmem>>, vector<8x32xf32>
    %cst_79 = arith.constant dense<0.000000e+00> : vector<16x32xf32>
    %193 = tpu.matmul %191, %192, %cst_79 {dimension_numbers = #tpu.dot_dimension_numbers<[1], [0], [0], [1], [0, 0, 1, 1], [], []>} : vector<16x8xf32>, vector<8x32xf32>, vector<16x32xf32> -> vector<16x32xf32>
    %194 = arith.addf %173, %193 : vector<16x32xf32>
    %195 = vector.extract_strided_slice %168 {offsets = [0, 0, 8], sizes = [2, 8, 8], strides = [1, 1, 1]} : vector<2x8x32xf32> to vector<2x8x8xf32>
    %196 = vector.extract_strided_slice %170 {offsets = [0, 0, 8], sizes = [2, 8, 8], strides = [1, 1, 1]} : vector<2x8x32xf32> to vector<2x8x8xf32>
    %197 = vector.extract_strided_slice %172 {offsets = [0, 0, 8], sizes = [2, 8, 8], strides = [1, 1, 1]} : vector<2x8x32xf32> to vector<2x8x8xf32>
    "tpu.trace_start"() <{level = 10 : i32, message = "bsd,btd->bst"}> : () -> ()
    %cst_80 = arith.constant dense<0.000000e+00> : vector<2x8x8xf32>
    %198 = tpu.matmul %195, %196, %cst_80 {dimension_numbers = #tpu.dot_dimension_numbers<[2], [2], [1], [1], [0, 0, 0, 1, 1, 1], [0], [0]>} : vector<2x8x8xf32>, vector<2x8x8xf32>, vector<2x8x8xf32> -> vector<2x8x8xf32>
    "tpu.trace_stop"() : () -> ()
    %cst_81 = arith.constant 0.353553385 : f32
    %199 = vector.broadcast %cst_81 : f32 to vector<2x8x8xf32>
    %200 = arith.mulf %198, %199 : vector<2x8x8xf32>
    %cst_82 = arith.constant dense<0xFF800000> : vector<2x8xf32>
    %201 = vector.multi_reduction <maximumf>, %200, %cst_82 [2] : vector<2x8x8xf32> to vector<2x8xf32>
    %202 = vector.shape_cast %201 : vector<2x8xf32> to vector<2x8x1xf32>
    %203 = vector.broadcast %202 : vector<2x8x1xf32> to vector<2x8x8xf32>
    %204 = arith.subf %200, %203 : vector<2x8x8xf32>
    %205 = math.exp %204 : vector<2x8x8xf32>
    %cst_83 = arith.constant dense<0.000000e+00> : vector<2x8xf32>
    %206 = vector.multi_reduction <add>, %205, %cst_83 [2] : vector<2x8x8xf32> to vector<2x8xf32>
    %207 = vector.shape_cast %206 : vector<2x8xf32> to vector<2x8x1xf32>
    %208 = tpu.reciprocal %207 {approx = true} : vector<2x8x1xf32> -> vector<2x8x1xf32>
    %209 = vector.broadcast %208 : vector<2x8x1xf32> to vector<2x8x8xf32>
    %210 = arith.mulf %205, %209 : vector<2x8x8xf32>
    "tpu.trace_start"() <{level = 10 : i32, message = "bst,btd->bsd"}> : () -> ()
    %cst_84 = arith.constant dense<0.000000e+00> : vector<2x8x8xf32>
    %211 = tpu.matmul %210, %197, %cst_84 {dimension_numbers = #tpu.dot_dimension_numbers<[2], [1], [1], [2], [0, 0, 0, 1, 1, 2], [0], [0]>} : vector<2x8x8xf32>, vector<2x8x8xf32>, vector<2x8x8xf32> -> vector<2x8x8xf32>
    "tpu.trace_stop"() : () -> ()
    %212 = vector.shape_cast %211 : vector<2x8x8xf32> to vector<16x8xf32>
    %c8_85 = arith.constant 8 : index
    %c0_86 = arith.constant 0 : index
    %213 = vector.load %arg15[%c8_85, %c0_86] : memref<32x32xf32, #tpu.memory_space<vmem>>, vector<8x32xf32>
    %cst_87 = arith.constant dense<0.000000e+00> : vector<16x32xf32>
    %214 = tpu.matmul %212, %213, %cst_87 {dimension_numbers = #tpu.dot_dimension_numbers<[1], [0], [0], [1], [0, 0, 1, 1], [], []>} : vector<16x8xf32>, vector<8x32xf32>, vector<16x32xf32> -> vector<16x32xf32>
    %215 = arith.addf %194, %214 : vector<16x32xf32>
    %216 = vector.extract_strided_slice %168 {offsets = [0, 0, 16], sizes = [2, 8, 8], strides = [1, 1, 1]} : vector<2x8x32xf32> to vector<2x8x8xf32>
    %217 = vector.extract_strided_slice %170 {offsets = [0, 0, 16], sizes = [2, 8, 8], strides = [1, 1, 1]} : vector<2x8x32xf32> to vector<2x8x8xf32>
    %218 = vector.extract_strided_slice %172 {offsets = [0, 0, 16], sizes = [2, 8, 8], strides = [1, 1, 1]} : vector<2x8x32xf32> to vector<2x8x8xf32>
    "tpu.trace_start"() <{level = 10 : i32, message = "bsd,btd->bst"}> : () -> ()
    %cst_88 = arith.constant dense<0.000000e+00> : vector<2x8x8xf32>
    %219 = tpu.matmul %216, %217, %cst_88 {dimension_numbers = #tpu.dot_dimension_numbers<[2], [2], [1], [1], [0, 0, 0, 1, 1, 1], [0], [0]>} : vector<2x8x8xf32>, vector<2x8x8xf32>, vector<2x8x8xf32> -> vector<2x8x8xf32>
    "tpu.trace_stop"() : () -> ()
    %cst_89 = arith.constant 0.353553385 : f32
    %220 = vector.broadcast %cst_89 : f32 to vector<2x8x8xf32>
    %221 = arith.mulf %219, %220 : vector<2x8x8xf32>
    %cst_90 = arith.constant dense<0xFF800000> : vector<2x8xf32>
    %222 = vector.multi_reduction <maximumf>, %221, %cst_90 [2] : vector<2x8x8xf32> to vector<2x8xf32>
    %223 = vector.shape_cast %222 : vector<2x8xf32> to vector<2x8x1xf32>
    %224 = vector.broadcast %223 : vector<2x8x1xf32> to vector<2x8x8xf32>
    %225 = arith.subf %221, %224 : vector<2x8x8xf32>
    %226 = math.exp %225 : vector<2x8x8xf32>
    %cst_91 = arith.constant dense<0.000000e+00> : vector<2x8xf32>
    %227 = vector.multi_reduction <add>, %226, %cst_91 [2] : vector<2x8x8xf32> to vector<2x8xf32>
    %228 = vector.shape_cast %227 : vector<2x8xf32> to vector<2x8x1xf32>
    %229 = tpu.reciprocal %228 {approx = true} : vector<2x8x1xf32> -> vector<2x8x1xf32>
    %230 = vector.broadcast %229 : vector<2x8x1xf32> to vector<2x8x8xf32>
    %231 = arith.mulf %226, %230 : vector<2x8x8xf32>
    "tpu.trace_start"() <{level = 10 : i32, message = "bst,btd->bsd"}> : () -> ()
    %cst_92 = arith.constant dense<0.000000e+00> : vector<2x8x8xf32>
    %232 = tpu.matmul %231, %218, %cst_92 {dimension_numbers = #tpu.dot_dimension_numbers<[2], [1], [1], [2], [0, 0, 0, 1, 1, 2], [0], [0]>} : vector<2x8x8xf32>, vector<2x8x8xf32>, vector<2x8x8xf32> -> vector<2x8x8xf32>
    "tpu.trace_stop"() : () -> ()
    %233 = vector.shape_cast %232 : vector<2x8x8xf32> to vector<16x8xf32>
    %c16_93 = arith.constant 16 : index
    %c0_94 = arith.constant 0 : index
    %234 = vector.load %arg15[%c16_93, %c0_94] : memref<32x32xf32, #tpu.memory_space<vmem>>, vector<8x32xf32>
    %cst_95 = arith.constant dense<0.000000e+00> : vector<16x32xf32>
    %235 = tpu.matmul %233, %234, %cst_95 {dimension_numbers = #tpu.dot_dimension_numbers<[1], [0], [0], [1], [0, 0, 1, 1], [], []>} : vector<16x8xf32>, vector<8x32xf32>, vector<16x32xf32> -> vector<16x32xf32>
    %236 = arith.addf %215, %235 : vector<16x32xf32>
    %237 = vector.extract_strided_slice %168 {offsets = [0, 0, 24], sizes = [2, 8, 8], strides = [1, 1, 1]} : vector<2x8x32xf32> to vector<2x8x8xf32>
    %238 = vector.extract_strided_slice %170 {offsets = [0, 0, 24], sizes = [2, 8, 8], strides = [1, 1, 1]} : vector<2x8x32xf32> to vector<2x8x8xf32>
    %239 = vector.extract_strided_slice %172 {offsets = [0, 0, 24], sizes = [2, 8, 8], strides = [1, 1, 1]} : vector<2x8x32xf32> to vector<2x8x8xf32>
    "tpu.trace_start"() <{level = 10 : i32, message = "bsd,btd->bst"}> : () -> ()
    %cst_96 = arith.constant dense<0.000000e+00> : vector<2x8x8xf32>
    %240 = tpu.matmul %237, %238, %cst_96 {dimension_numbers = #tpu.dot_dimension_numbers<[2], [2], [1], [1], [0, 0, 0, 1, 1, 1], [0], [0]>} : vector<2x8x8xf32>, vector<2x8x8xf32>, vector<2x8x8xf32> -> vector<2x8x8xf32>
    "tpu.trace_stop"() : () -> ()
    %cst_97 = arith.constant 0.353553385 : f32
    %241 = vector.broadcast %cst_97 : f32 to vector<2x8x8xf32>
    %242 = arith.mulf %240, %241 : vector<2x8x8xf32>
    %cst_98 = arith.constant dense<0xFF800000> : vector<2x8xf32>
    %243 = vector.multi_reduction <maximumf>, %242, %cst_98 [2] : vector<2x8x8xf32> to vector<2x8xf32>
    %244 = vector.shape_cast %243 : vector<2x8xf32> to vector<2x8x1xf32>
    %245 = vector.broadcast %244 : vector<2x8x1xf32> to vector<2x8x8xf32>
    %246 = arith.subf %242, %245 : vector<2x8x8xf32>
    %247 = math.exp %246 : vector<2x8x8xf32>
    %cst_99 = arith.constant dense<0.000000e+00> : vector<2x8xf32>
    %248 = vector.multi_reduction <add>, %247, %cst_99 [2] : vector<2x8x8xf32> to vector<2x8xf32>
    %249 = vector.shape_cast %248 : vector<2x8xf32> to vector<2x8x1xf32>
    %250 = tpu.reciprocal %249 {approx = true} : vector<2x8x1xf32> -> vector<2x8x1xf32>
    %251 = vector.broadcast %250 : vector<2x8x1xf32> to vector<2x8x8xf32>
    %252 = arith.mulf %247, %251 : vector<2x8x8xf32>
    "tpu.trace_start"() <{level = 10 : i32, message = "bst,btd->bsd"}> : () -> ()
    %cst_100 = arith.constant dense<0.000000e+00> : vector<2x8x8xf32>
    %253 = tpu.matmul %252, %239, %cst_100 {dimension_numbers = #tpu.dot_dimension_numbers<[2], [1], [1], [2], [0, 0, 0, 1, 1, 2], [0], [0]>} : vector<2x8x8xf32>, vector<2x8x8xf32>, vector<2x8x8xf32> -> vector<2x8x8xf32>
    "tpu.trace_stop"() : () -> ()
    %254 = vector.shape_cast %253 : vector<2x8x8xf32> to vector<16x8xf32>
    %c24_101 = arith.constant 24 : index
    %c0_102 = arith.constant 0 : index
    %255 = vector.load %arg15[%c24_101, %c0_102] : memref<32x32xf32, #tpu.memory_space<vmem>>, vector<8x32xf32>
    %cst_103 = arith.constant dense<0.000000e+00> : vector<16x32xf32>
    %256 = tpu.matmul %254, %255, %cst_103 {dimension_numbers = #tpu.dot_dimension_numbers<[1], [0], [0], [1], [0, 0, 1, 1], [], []>} : vector<16x8xf32>, vector<8x32xf32>, vector<16x32xf32> -> vector<16x32xf32>
    %257 = arith.addf %236, %256 : vector<16x32xf32>
    %c0_104 = arith.constant 0 : index
    %c0_105 = arith.constant 0 : index
    %258 = vector.load %arg16[%c0_104, %c0_105] : memref<1x32xf32, #tpu.memory_space<vmem>>, vector<1x32xf32>
    %259 = vector.broadcast %258 : vector<1x32xf32> to vector<16x32xf32>
    %260 = arith.addf %257, %259 : vector<16x32xf32>
    %261 = arith.addf %161, %260 : vector<16x32xf32>
    %c0_106 = arith.constant 0 : index
    %c0_107 = arith.constant 0 : index
    %262 = vector.load %arg17[%c0_106, %c0_107] : memref<1x32xf32, #tpu.memory_space<vmem>>, vector<1x32xf32>
    %c0_108 = arith.constant 0 : index
    %c0_109 = arith.constant 0 : index
    %263 = vector.load %arg18[%c0_108, %c0_109] : memref<1x32xf32, #tpu.memory_space<vmem>>, vector<1x32xf32>
    %cst_110 = arith.constant dense<0.000000e+00> : vector<16xf32>
    %264 = vector.multi_reduction <add>, %261, %cst_110 [1] : vector<16x32xf32> to vector<16xf32>
    %265 = vector.shape_cast %264 : vector<16xf32> to vector<16x1xf32>
    %cst_111 = arith.constant 3.200000e+01 : f32
    %266 = vector.broadcast %cst_111 : f32 to vector<16x1xf32>
    %267 = arith.divf %265, %266 : vector<16x1xf32>
    %268 = vector.broadcast %267 : vector<16x1xf32> to vector<16x32xf32>
    %269 = arith.subf %261, %268 : vector<16x32xf32>
    %270 = arith.mulf %269, %269 : vector<16x32xf32>
    %cst_112 = arith.constant dense<0.000000e+00> : vector<16xf32>
    %271 = vector.multi_reduction <add>, %270, %cst_112 [1] : vector<16x32xf32> to vector<16xf32>
    %272 = vector.shape_cast %271 : vector<16xf32> to vector<16x1xf32>
    %cst_113 = arith.constant 3.200000e+01 : f32
    %273 = vector.broadcast %cst_113 : f32 to vector<16x1xf32>
    %274 = arith.divf %272, %273 : vector<16x1xf32>
    %275 = vector.broadcast %267 : vector<16x1xf32> to vector<16x32xf32>
    %276 = arith.subf %261, %275 : vector<16x32xf32>
    %cst_114 = arith.constant 9.99999974E-6 : f32
    %277 = vector.broadcast %cst_114 : f32 to vector<16x1xf32>
    %278 = arith.addf %274, %277 : vector<16x1xf32>
    %279 = math.rsqrt %278 : vector<16x1xf32>
    %280 = vector.broadcast %279 : vector<16x1xf32> to vector<16x32xf32>
    %281 = arith.mulf %276, %280 : vector<16x32xf32>
    %282 = vector.broadcast %262 : vector<1x32xf32> to vector<16x32xf32>
    %283 = arith.mulf %281, %282 : vector<16x32xf32>
    %284 = vector.broadcast %263 : vector<1x32xf32> to vector<16x32xf32>
    %285 = arith.addf %283, %284 : vector<16x32xf32>
    %c0_115 = arith.constant 0 : index
    %c0_116 = arith.constant 0 : index
    %286 = vector.load %arg19[%c0_115, %c0_116] : memref<32x64xf32, #tpu.memory_space<vmem>>, vector<32x64xf32>
    %cst_117 = arith.constant dense<0.000000e+00> : vector<16x64xf32>
    %287 = tpu.matmul %285, %286, %cst_117 {dimension_numbers = #tpu.dot_dimension_numbers<[1], [0], [0], [1], [0, 0, 1, 1], [], []>} : vector<16x32xf32>, vector<32x64xf32>, vector<16x64xf32> -> vector<16x64xf32>
    %c0_118 = arith.constant 0 : index
    %c0_119 = arith.constant 0 : index
    %288 = vector.load %arg20[%c0_118, %c0_119] : memref<1x64xf32, #tpu.memory_space<vmem>>, vector<1x64xf32>
    %289 = vector.broadcast %288 : vector<1x64xf32> to vector<16x64xf32>
    %290 = arith.addf %287, %289 : vector<16x64xf32>
    %cst_120 = arith.constant 0.000000e+00 : f32
    %291 = vector.broadcast %cst_120 : f32 to vector<16x64xf32>
    %292 = arith.maximumf %290, %291 : vector<16x64xf32>
    %c0_121 = arith.constant 0 : index
    %c0_122 = arith.constant 0 : index
    %293 = vector.load %arg21[%c0_121, %c0_122] : memref<64x32xf32, #tpu.memory_space<vmem>>, vector<64x32xf32>
    %cst_123 = arith.constant dense<0.000000e+00> : vector<16x32xf32>
    %294 = tpu.matmul %292, %293, %cst_123 {dimension_numbers = #tpu.dot_dimension_numbers<[1], [0], [0], [1], [0, 0, 1, 1], [], []>} : vector<16x64xf32>, vector<64x32xf32>, vector<16x32xf32> -> vector<16x32xf32>
    %c0_124 = arith.constant 0 : index
    %c0_125 = arith.constant 0 : index
    %295 = vector.load %arg22[%c0_124, %c0_125] : memref<1x32xf32, #tpu.memory_space<vmem>>, vector<1x32xf32>
    %296 = vector.broadcast %295 : vector<1x32xf32> to vector<16x32xf32>
    %297 = arith.addf %294, %296 : vector<16x32xf32>
    %298 = arith.addf %285, %297 : vector<16x32xf32>
    %c0_126 = arith.constant 0 : index
    %c0_127 = arith.constant 0 : index
    %299 = vector.load %arg23[%c0_126, %c0_127] : memref<1x32xf32, #tpu.memory_space<vmem>>, vector<1x32xf32>
    %c0_128 = arith.constant 0 : index
    %c0_129 = arith.constant 0 : index
    %300 = vector.load %arg24[%c0_128, %c0_129] : memref<1x32xf32, #tpu.memory_space<vmem>>, vector<1x32xf32>
    %cst_130 = arith.constant dense<0.000000e+00> : vector<16xf32>
    %301 = vector.multi_reduction <add>, %298, %cst_130 [1] : vector<16x32xf32> to vector<16xf32>
    %302 = vector.shape_cast %301 : vector<16xf32> to vector<16x1xf32>
    %cst_131 = arith.constant 3.200000e+01 : f32
    %303 = vector.broadcast %cst_131 : f32 to vector<16x1xf32>
    %304 = arith.divf %302, %303 : vector<16x1xf32>
    %305 = vector.broadcast %304 : vector<16x1xf32> to vector<16x32xf32>
    %306 = arith.subf %298, %305 : vector<16x32xf32>
    %307 = arith.mulf %306, %306 : vector<16x32xf32>
    %cst_132 = arith.constant dense<0.000000e+00> : vector<16xf32>
    %308 = vector.multi_reduction <add>, %307, %cst_132 [1] : vector<16x32xf32> to vector<16xf32>
    %309 = vector.shape_cast %308 : vector<16xf32> to vector<16x1xf32>
    %cst_133 = arith.constant 3.200000e+01 : f32
    %310 = vector.broadcast %cst_133 : f32 to vector<16x1xf32>
    %311 = arith.divf %309, %310 : vector<16x1xf32>
    %312 = vector.broadcast %304 : vector<16x1xf32> to vector<16x32xf32>
    %313 = arith.subf %298, %312 : vector<16x32xf32>
    %cst_134 = arith.constant 9.99999974E-6 : f32
    %314 = vector.broadcast %cst_134 : f32 to vector<16x1xf32>
    %315 = arith.addf %311, %314 : vector<16x1xf32>
    %316 = math.rsqrt %315 : vector<16x1xf32>
    %317 = vector.broadcast %316 : vector<16x1xf32> to vector<16x32xf32>
    %318 = arith.mulf %313, %317 : vector<16x32xf32>
    %319 = vector.broadcast %299 : vector<1x32xf32> to vector<16x32xf32>
    %320 = arith.mulf %318, %319 : vector<16x32xf32>
    %321 = vector.broadcast %300 : vector<1x32xf32> to vector<16x32xf32>
    %322 = arith.addf %320, %321 : vector<16x32xf32>
    %c0_135 = arith.constant 0 : index
    %c0_136 = arith.constant 0 : index
    %323 = vector.load %arg25[%c0_135, %c0_136] : memref<32x128xf32, #tpu.memory_space<vmem>>, vector<32x128xf32>
    %cst_137 = arith.constant dense<0.000000e+00> : vector<16x128xf32>
    %324 = tpu.matmul %322, %323, %cst_137 {dimension_numbers = #tpu.dot_dimension_numbers<[1], [0], [0], [1], [0, 0, 1, 1], [], []>} : vector<16x32xf32>, vector<32x128xf32>, vector<16x128xf32> -> vector<16x128xf32>
    %c0_138 = arith.constant 0 : index
    %c0_139 = arith.constant 0 : index
    %325 = vector.load %arg26[%c0_138, %c0_139] : memref<1x128xf32, #tpu.memory_space<vmem>>, vector<1x128xf32>
    %326 = vector.broadcast %325 : vector<1x128xf32> to vector<16x128xf32>
    %327 = arith.addf %324, %326 : vector<16x128xf32>
    %c0_140 = arith.constant 0 : index
    %c0_141 = arith.constant 0 : index
    %328 = vector.load %arg27[%c0_140, %c0_141] : memref<16x128xf32, #tpu.memory_space<vmem>>, vector<16x128xf32>
    tpu.vector_store %arg27[%c0_140, %c0_141], %327 {strides = array<i32>} : memref<16x128xf32, #tpu.memory_space<vmem>>, vector<16x128xf32>,
    return
  }
}

</mosaic_0001>

<bundles_post_ra>
// kernel: tpu_custom_call.1
= control target key start
LH: loop header
LB: loop body
LE: loop exit
PB: predicated region body
PF: predicated region fallthrough
CT: control target
= control target key end

     0   :  { %s2940_s0 = inlined_call_operand.hbm [shape: f32[16,32], index: 0, kind: input, shape index: {}]   ;;  %s2941_s1 = inlined_call_operand.vmem [shape: f32[32,96], index: 1, kind: input, shape index: {}]   ;;  %s2942_s2 = inlined_call_operand.hbm [shape: f32[1,96], index: 2, kind: input, shape index: {}]   ;;  %s2943_s3 = inlined_call_operand.vmem [shape: f32[32,32], index: 3, kind: input, shape index: {}]   ;;  %s2944_s4 = inlined_call_operand.vmem [shape: f32[1,32], index: 4, kind: input, shape index: {}]   ;;  %s2945_s5 = inlined_call_operand.vmem [shape: f32[1,32], index: 5, kind: input, shape index: {}]   ;;  %s2946_s6 = inlined_call_operand.vmem [shape: f32[1,32], index: 6, kind: input, shape index: {}]   ;;  %s2947_s7 = inlined_call_operand.vmem [shape: f32[32,64], index: 7, kind: input, shape index: {}]   ;;  %s2948_s8 = inlined_call_operand.vmem [shape: f32[1,64], index: 8, kind: input, shape index: {}]   ;;  %s2949_s9 = inlined_call_operand.vmem [shape: f32[64,32], index: 9, kind: input, shape index: {}]   ;;  %s2950_s10 = inlined_call_operand.vmem [shape: f32[1,32], index: 10, kind: input, shape index: {}]   ;;  %s2951_s11 = inlined_call_operand.vmem [shape: f32[1,32], index: 11, kind: input, shape index: {}]   ;;  %s2952_s12 = inlined_call_operand.vmem [shape: f32[1,32], index: 12, kind: input, shape index: {}]   ;;  %s2953_s13 = inlined_call_operand.vmem [shape: f32[32,96], index: 13, kind: input, shape index: {}]   ;;  %s2954_s14 = inlined_call_operand.vmem [shape: f32[1,96], index: 14, kind: input, shape index: {}]   ;;  %s2955_s15 = inlined_call_operand.vmem [shape: f32[32,32], index: 15, kind: input, shape index: {}]   ;;  %s2956_s16 = inlined_call_operand.vmem [shape: f32[1,32], index: 16, kind: input, shape index: {}]   ;;  %s2957_s17 = inlined_call_operand.vmem [shape: f32[1,32], index: 17, kind: input, shape index: {}]   ;;  %s2958_s18 = inlined_call_operand.vmem [shape: f32[1,32], index: 18, kind: input, shape index: {}]   ;;  %s2959_s19 = inlined_call_operand.hbm [shape: f32[32,64], index: 19, kind: input, shape index: {}]   ;;  %s2960_s20 = inlined_call_operand.vmem [shape: f32[1,64], index: 20, kind: input, shape index: {}]   ;;  %s2961_s21 = inlined_call_operand.vmem [shape: f32[64,32], index: 21, kind: input, shape index: {}]   ;;  %s2962_s22 = inlined_call_operand.vmem [shape: f32[1,32], index: 22, kind: input, shape index: {}]   ;;  %s2963_s23 = inlined_call_operand.vmem [shape: f32[1,32], index: 23, kind: input, shape index: {}]   ;;  %s2964_s24 = inlined_call_operand.vmem [shape: f32[1,32], index: 24, kind: input, shape index: {}]   ;;  %s2965_s25 = inlined_call_operand.hbm [shape: f32[32,128], index: 25, kind: input, shape index: {}]   ;;  %s2966_s26 = inlined_call_operand.vmem [shape: f32[1,128], index: 26, kind: input, shape index: {}]   ;;  %s2967_s27 = inlined_call_operand.hbm [shape: f32[16,128], index: 27, kind: output, shape index: {}]  }
   0x1   :  { %2984 = sst [smem:[#allocation15_spill]] %s2940_s0 }
   0x2   :  { %2985 = sst [smem:[#allocation16_spill]] %s2941_s1 }
   0x3   :  { %2986 = sst [smem:[#allocation17_spill]] %s2942_s2 }
   0x4   :  { %2987 = sst [smem:[#allocation18_spill]] %s2943_s3 }
   0x5   :  { %2988 = sst [smem:[#allocation19_spill]] %s2944_s4 }
   0x6   :  { %2989 = sst [smem:[#allocation20_spill]] %s2945_s5 }
   0x7   :  { %2990 = sst [smem:[#allocation21_spill]] %s2946_s6 }
   0x8   :  { %2991 = sst [smem:[#allocation22_spill]] %s2947_s7 }
   0x9   :  { %2992 = sst [smem:[#allocation23_spill]] %s2948_s8 }
   0xa   :  { %2993 = sst [smem:[#allocation24_spill]] %s2949_s9 }
   0xb   :  { %2994 = sst [smem:[#allocation25_spill]] %s2950_s10 }
   0xc   :  { %2995 = sst [smem:[#allocation26_spill]] %s2951_s11 }
   0xd   :  { %32 = vsyncpa [#allocation3], 0 }
   0xe   :  { %33 = vsyncpa [#allocation6], 0 }
   0xf   :  { %34 = vsyncpa [#allocation9], 0  ;;  %s2996_s8 = sld [smem:[#allocation17_spill]] }
  0x15   :  { %s56_s30 = sshll.u32 %s2996_s8, 4  ;;  %s57_s30 = int_to_ptr.hbm [resolvable:$true] %s56_s30 }
  0x16   :  { %35 = vsyncpa [#allocation4], 0  ;;  %s2327_s9 = smov [#allocation5]   ;;  %s2997_s10 = sld [smem:[#allocation15_spill]] }
  0x17   :  { %s58_s5 = sshll.u32 %s2327_s9, 4  ;;  %s2328_s1 = smov [#allocation2]   ;;  %s59_s5 = int_to_ptr.vmem [resolvable:$true] %s58_s5 }
  0x18   :  { %61 = dma.hbm_to_vmem [thread:$0]  %s57_s30, 16, %s59_s5, [#allocation6]  }
  0x19   :  { %s42_s6 = sshll.u32 %s2328_s1, 4  ;;  %s2972_s11 = smov 128   ;;  %s43_s6 = int_to_ptr.vmem [resolvable:$true] %s42_s6 }
  0x1a   :  { %s2973_s2 = smov 8   ;;  %s98_s4 = sshll.u32 %s2959_s19, 4  ;;  %s99_s4 = int_to_ptr.hbm [resolvable:$true] %s98_s4 }
  0x1b   :  { %s2331_s8 = smov [#allocation7]   ;;  %s121_s5 = sshll.u32 %s2965_s25, 4  ;;  %s122_s5 = int_to_ptr.hbm [resolvable:$true] %s121_s5 }
  0x1c   :  { %s40_s29 = sshll.u32 %s2997_s10, 4  ;;  %s100_s9 = sshll.u32 %s2331_s8, 4  ;;  %s41_s29 = int_to_ptr.hbm [resolvable:$true] %s40_s29  ;;  %s101_s9 = int_to_ptr.vmem [resolvable:$true] %s100_s9 }
  0x1d   :  { %48 = dma.hbm_to_vmem [thread:$0]  %s41_s29, 256, %s43_s6, [#allocation3], %s2972_s11, %s2972_s11, %s2973_s2  }
  0x1e   :  { %106 = dma.hbm_to_vmem [thread:$0]  %s99_s4, 512, %s101_s9, [#allocation6], %s2972_s11, %s2972_s11, %s2973_s2  }
  0x1f   :  { %s2332_s0 = smov [#allocation8]  }
  0x20   :  { %s123_s10 = sshll.u32 %s2332_s0, 4  ;;  %s124_s10 = int_to_ptr.vmem [resolvable:$true] %s123_s10 }
  0x21   :  { %129 = dma.hbm_to_vmem [thread:$0]  %s122_s5, 512, %s124_s10, [#allocation9], %s2972_s11, %s2972_s11, %s2973_s2  }
  0x22   :  { %2319 = dma.done.wait [#allocation3], 256  }
  0x23   :  { %2320 = vsyncadd [#allocation3], 4294967040 }
  0x24   :  { %2321 = dma.done.wait [#allocation6], 528  }
  0x25   :  { %2322 = vsyncadd [#allocation6], 4294966768 }
  0x26   :  { %2323 = dma.done.wait [#allocation9], 512  }
  0x27   :  { %2324 = vsyncadd [#allocation9], 4294966784  ;;  %s2998_s29 = sld [smem:[#allocation16_spill]]  ;;  %vm158_vm0 = vcmask 261120   ;;  %v2519_v4 = vld [vmem:[#allocation2] sm:$0xff]  ;;  %v2523_v5 = vld [vmem:[#allocation2 + $0x8] sm:$0xff] }
  0x28   :  { %v2100_v6 = vld [vmem:[#allocation5] ss:$0 sm:$0xff]  ;;  %s2333_s9 = smov 88   ;;  %s2334_s28 = smov 96   ;;  %vm191_vm1 = vcmask 64512   ;;  %vm961_vm6 = vcmask 523264  }
  0x29   :  { %s2335_s30 = smov 120   ;;  %s2336_s5 = smov 64  }
  0x2a   :  { %s2982_s0 = smov 112   ;;  %s2338_s10 = smov 80  }
  0x2b   :  { %s2339_s19 = smov 56   ;;  %s2980_s25 = smov 72  }
  0x2c   :  { %s2999_s3 = sld [smem:[#allocation18_spill]]  ;;  %s2978_s8 = smov 48  }
  0x2d   :  { %v153_v0 = vld [vmem:[%s2998_s29 + $0x18] sm:$0xff]  ;;  %v152_v1 = vld [vmem:[%s2998_s29 + $0x10] sm:$0xff]  ;;  %v151_v2 = vld [vmem:[%s2998_s29 + $0x8] sm:$0xff]  ;;  %s2974_s1 = smov 40   ;;  %s3000_s4 = sld [smem:[#allocation19_spill]] }
  0x2e   :  { %177 = vmatpush.msra.mxu0 %v153_v0  ;;  %v150_v3 = vld [vmem:[%s2998_s29] sm:$0xff]  ;;  %s2976_s29 = smov 104   ;;  %s3001_s7 = sld [smem:[#allocation22_spill]] }
  0x2f   :  { %s3003_s6 = sld [smem:[#allocation21_spill]]  ;;  %s3010_s11 = smov 48  }
  0x30   :  { %178 = vmatpush.msra.mxu0 %v152_v1  ;;  %s3011_s2 = smov 104  }
  0x32   :  { %179 = vmatpush.msra.mxu0 %v151_v2  ;;  %v319_v52 = vld [vmem:[%s2999_s3] sm:$0xff] }
  0x34   :  { %180 = vmatpush.msra.mxu0 %v150_v3 }
  0x35   :  { %1998 = vmatmul.msk.f32.vlgmr.msra.gmra.mxu0 %vm158_vm0, %v2519_v4 }
  0x36   :  { %503 = vmatpush.msrb.mxu0 %v319_v52 }
  0x3d   :  { %1999 = vmatmul.msk.f32.gmra.mxu0 %vm158_vm0, %v2523_v5 }
  0xb2   :  { %v182_v7 = vpop.f32.mrf.mxu0 }
  0xb3   :  { %v2527_v8 = vadd.f32 %v2100_v6, %v182_v7 }
  0xb5   :  { %322 = vrot.lane.b32.xlu1 %v2527_v8, %s2333_s9  ;;  %189 = vrot.lane.b32.xlu0 %v2527_v8, %s2334_s28 }
  0xba   :  { %v185_v9 = vpop.f32.mrf.mxu0 }
  0xbb   :  { %v2533_v10 = vadd.f32 %v2100_v6, %v185_v9  ;;  %v452_v9 = vld [vmem:[%s2999_s3 + $0x8] sm:$0xff] }
  0xbd   :  { %350 = vrot.lane.b32.xlu2 %v2533_v10, %s2333_s9  ;;  %320 = vrot.lane.b32.xlu1 %v2527_v8, %s2335_s30  ;;  %v2095_v26 = vpack.i.bf16 %v2533_v10, %v2527_v8 }
  0xbe   :  { %217 = vrot.lane.b32.xlu0 %v2533_v10, %s2334_s28 }
  0xc5   :  { %348 = vrot.lane.b32.xlu2 %v2533_v10, %s2335_s30 }
 0x117   :  { %v351_v14 = vpop.permute.xlu2 %350 }
 0x11f   :  { %v349_v16 = vpop.permute.xlu2 %348 }
 0x127   :  { %v323_v11 = vpop.permute.xlu1 %322  ;;  %v190_v12 = vpop.permute.xlu0 %189 }
 0x128   :  { %2000 = vmatpush.xpose.msk.msra.mxu1 %vm191_vm1, %v190_v12 }
 0x12b   :  { %2001 = vmatmul.msk.f32.vlgmr.msra.gmra.mxu1 %vm191_vm1, %v2527_v8 }
 0x12c   :  { %2006 = vmatpush.xpose.msk.msrb.mxu1 %vm191_vm1, %v323_v11 }
 0x12f   :  { %v321_v15 = vpop.permute.xlu1 %320 }
 0x130   :  { %v218_v13 = vpop.permute.xlu0 %217 }
 0x131   :  { %2002 = vmatpush.xpose.msk.msra.mxu2 %vm191_vm1, %v218_v13 }
 0x133   :  { %2007 = vmatmul.msk.f32.vlgmr.msrb.gmra.mxu1 %vm191_vm1, %v321_v15 }
 0x134   :  { %2003 = vmatmul.msk.f32.vlgmr.msra.gmra.mxu2 %vm191_vm1, %v2533_v10 }
 0x135   :  { %2008 = vmatpush.xpose.msk.msrb.mxu2 %vm191_vm1, %v351_v14 }
 0x139   :  { %474 = vmatpush.msra.mxu2 %v452_v9 }
 0x13c   :  { %2009 = vmatmul.msk.f32.vlgmr.msrb.gmra.mxu2 %vm191_vm1, %v349_v16 }
 0x1a8   :  { %v213_v17 = vpop.f32.mrf.mxu1 }
 0x1a9   :  { %v243_v18 = vmul.f32 0.35355338, %v213_v17 }
 0x1ab   :  { %v245_v19 = vsel %vm191_vm1, %v243_v18, -inf }
 0x1ac   :  { %246 = vmax.xlane.f32.xlu0 %v245_v19 }
 0x1b0   :  { %v345_v20 = vpop.f32.mrf.mxu1 }
 0x1b1   :  { %v376_v21 = vmul.f32 0.35355338, %v345_v20 }
 0x1b3   :  { %v378_v22 = vsel %vm191_vm1, %v376_v21, -inf }
 0x1b4   :  { %379 = vmax.xlane.f32.xlu2 %v378_v22 }
 0x1b7   :  { %v240_v23 = vpop.f32.mrf.mxu2 }
 0x1b8   :  { %v244_v24 = vmul.f32 0.35355338, %v240_v23 }
 0x1ba   :  { %v248_v25 = vsel %vm191_vm1, %v244_v24, -inf }
 0x1bb   :  { %249 = vmax.xlane.f32.xlu1 %v248_v25 }
 0x1bf   :  { %v373_v45 = vpop.f32.mrf.mxu2 }
 0x1c0   :  { %v377_v46 = vmul.f32 0.35355338, %v373_v45 }
 0x1c2   :  { %v381_v47 = vsel %vm191_vm1, %v377_v46, -inf }
 0x1d4   :  { %2096 = vrot.lane.b32.xlu1 %v2095_v26, %s2336_s5 }
 0x1dc   :  { %511 = vrot.lane.b32.xlu1 %v2527_v8, %s2982_s0 }
 0x21f   :  { %v247_v27 = vpop.xlane.xlu0 %246 }
 0x220   :  { %v251_v28 = vsub.f32 %v243_v18, %v247_v27 }
 0x222   :  { %v253_v29 = vmul.f32 1.442695, %v251_v28 }
 0x224   :  { %2117 = vpow2.f32 %v253_v29 }
 0x227   :  { %v380_v30 = vpop.xlane.xlu2 %379 }
 0x228   :  { %v384_v31 = vsub.f32 %v376_v21, %v380_v30 }
 0x22a   :  { %v2118_v32 = vpop.eup %2117  ;;  %v386_v33 = vmul.f32 1.442695, %v384_v31 }
 0x22b   :  { %v257_v34 = vsel %vm191_vm1, %v2118_v32, 0.0 }
 0x22c   :  { %2119 = vpow2.f32 %v386_v33  ;;  %258 = vadd.xlane.f32.xlu2 %v257_v34 }
 0x22e   :  { %v250_v35 = vpop.xlane.xlu1 %249 }
 0x22f   :  { %v252_v36 = vsub.f32 %v244_v24, %v250_v35 }
 0x231   :  { %v255_v37 = vmul.f32 1.442695, %v252_v36 }
 0x232   :  { %v2120_v38 = vpop.eup %2119 }
 0x233   :  { %2121 = vpow2.f32 %v255_v37  ;;  %v390_v39 = vsel %vm191_vm1, %v2120_v38, 0.0 }
 0x234   :  { %391 = vadd.xlane.f32.xlu2 %v390_v39 }
 0x239   :  { %v2122_v40 = vpop.eup %2121 }
 0x23a   :  { %v260_v41 = vsel %vm191_vm1, %v2122_v40, 0.0 }
 0x23b   :  { %261 = vadd.xlane.f32.xlu0 %v260_v41 }
 0x246   :  { %v2097_v42 = vpop.permute.xlu1 %2096 }
 0x247   :  { %v2098_v43 = vunpack.i.l.bf16 %v2097_v42  ;;  %v2099_v44 = vunpack.i.h.bf16 %v2097_v42 }
 0x249   :  { %288 = vmatpush.msra.mxu3 %v2098_v43 }
 0x24b   :  { %314 = vmatpush.msrb.mxu3 %v2099_v44 }
 0x24c   :  { %513 = vrot.lane.b32.xlu2 %v2527_v8, %s2338_s10 }
 0x24e   :  { %v512_v63 = vpop.permute.xlu1 %511 }
 0x24f   :  { %400 = vrot.lane.b32.xlu0 %v2527_v8, %s2339_s19 }
 0x254   :  { %426 = vrot.lane.b32.xlu2 %v2533_v10, %s2339_s19 }
 0x25c   :  { %541 = vrot.lane.b32.xlu2 %v2533_v10, %s2338_s10 }
 0x264   :  { %539 = vrot.lane.b32.xlu2 %v2533_v10, %s2982_s0  ;;  %s3006_s0 = sld [smem:[#allocation25_spill]] }
 0x26c   :  { %677 = vrot.lane.b32.xlu2 %v2527_v8, %s2980_s25 }
 0x279   :  { %382 = vmax.xlane.f32.xlu0 %v381_v47 }
 0x28d   :  { %675 = vrot.lane.b32.xlu0 %v2527_v8, %s2976_s29 }
 0x295   :  { %705 = vrot.lane.b32.xlu0 %v2533_v10, %s2980_s25 }
 0x29d   :  { %703 = vrot.lane.b32.xlu0 %v2533_v10, %s2976_s29 }
 0x29f   :  { %v259_v48 = vpop.xlane.xlu2 %258 }
 0x2a0   :  { %2123 = vrcp.f32 %v259_v48 }
 0x2a6   :  { %v2124_v49 = vpop.eup %2123 }
 0x2a7   :  { %v392_v50 = vpop.xlane.xlu2 %391  ;;  %v265_v51 = vmul.f32 %v2124_v49, %v2118_v32 }
 0x2a9   :  { %2004 = vmatmul.msk.f32.vlgmr.msra.gmra.mxu3 %vm191_vm1, %v265_v51 }
 0x2ae   :  { %v262_v53 = vpop.xlane.xlu0 %261 }
 0x2af   :  { %2125 = vrcp.f32 %v262_v53  ;;  %v514_v54 = vpop.permute.xlu2 %513 }
 0x2b0   :  { %2127 = vrcp.f32 %v392_v50  ;;  %v643_v50 = vld [vmem:[%s2999_s3 + $0x10] sm:$0xff] }
 0x2b1   :  { %665 = vmatpush.msrb.mxu2 %v643_v50 }
 0x2b5   :  { %v2126_v55 = vpop.eup %2125 }
 0x2b6   :  { %v266_v56 = vmul.f32 %v2126_v55, %v2122_v40  ;;  %v2128_v58 = vpop.eup %2127 }
 0x2b7   :  { %v427_v57 = vpop.permute.xlu2 %426  ;;  %v398_v60 = vmul.f32 %v2128_v58, %v2120_v38 }
 0x2b8   :  { %2005 = vmatmul.msk.f32.vlgmr.msrb.gmra.mxu3 %vm191_vm1, %v266_v56  ;;  %447 = vmatpush.msra.mxu1 %v427_v57 }
 0x2bf   :  { %v542_v59 = vpop.permute.xlu2 %541 }
 0x2c0   :  { %2018 = vmatpush.xpose.msk.msrb.mxu1 %vm191_vm1, %v542_v59 }
 0x2c1   :  { %v401_v61 = vpop.permute.xlu0 %400 }
 0x2c2   :  { %421 = vmatpush.msra.mxu3 %v401_v61 }
 0x2c3   :  { %2010 = vmatmul.msk.f32.vlgmr.msra.gmra.mxu3 %vm191_vm1, %v398_v60 }
 0x2c4   :  { %2016 = vmatpush.xpose.msk.msrb.mxu3 %vm191_vm1, %v514_v54 }
 0x2c7   :  { %v540_v62 = vpop.permute.xlu2 %539 }
 0x2cb   :  { %2017 = vmatmul.msk.f32.vlgmr.msrb.gmra.mxu3 %vm191_vm1, %v512_v63 }
 0x2cf   :  { %v678_v0 = vpop.permute.xlu2 %677 }
 0x2d0   :  { %2024 = vmatpush.xpose.msk.msra.mxu0 %vm191_vm1, %v678_v0 }
 0x2ec   :  { %v383_v1 = vpop.xlane.xlu0 %382 }
 0x2ed   :  { %v385_v2 = vsub.f32 %v377_v46, %v383_v1 }
 0x2ef   :  { %v388_v3 = vmul.f32 1.442695, %v385_v2 }
 0x2f1   :  { %2129 = vpow2.f32 %v388_v3  ;;  %v807_v3 = vld [vmem:[%s2999_s3 + $0x18] sm:$0xff]  ;;  %s1983_s3 = sshll.u32 %s2967_s27, 4  ;;  %s1984_s3 = int_to_ptr.hbm [resolvable:$true] %s1983_s3 }
 0x2f7   :  { %v2130_v6 = vpop.eup %2129 }
 0x2f8   :  { %v393_v7 = vsel %vm191_vm1, %v2130_v6, 0.0 }
 0x2f9   :  { %394 = vadd.xlane.f32.xlu1 %v393_v7 }
 0x2ff   :  { %v676_v13 = vpop.permute.xlu0 %675 }
 0x307   :  { %v706_v37 = vpop.permute.xlu0 %705 }
 0x30f   :  { %v704_v40 = vpop.permute.xlu0 %703 }
 0x32c   :  { %v290_v11 = vpop.f32.mrf.mxu3 }
 0x32d   :  { %2014 = vmatmul.msk.f32.vlgmr.msrb.gmra.mxu0 %vm191_vm1, %v290_v11 }
 0x33b   :  { %v316_v12 = vpop.f32.mrf.mxu3 }
 0x33c   :  { %2015 = vmatmul.msk.f32.gmra.mxu0 %vm191_vm1, %v316_v12 }
 0x344   :  { %2025 = vmatmul.msk.f32.vlgmr.msra.gmra.mxu0 %vm191_vm1, %v676_v13 }
 0x346   :  { %v423_v14 = vpop.f32.mrf.mxu3 }
 0x347   :  { %2012 = vmatmul.msk.f32.vlgmr.msra.gmra.mxu2 %vm191_vm1, %v423_v14 }
 0x34e   :  { %v536_v15 = vpop.f32.mrf.mxu3 }
 0x34f   :  { %v567_v16 = vmul.f32 0.35355338, %v536_v15 }
 0x351   :  { %v569_v17 = vsel %vm191_vm1, %v567_v16, -inf }
 0x352   :  { %570 = vmax.xlane.f32.xlu2 %v569_v17 }
 0x36c   :  { %v395_v18 = vpop.xlane.xlu1 %394 }
 0x36d   :  { %2131 = vrcp.f32 %v395_v18 }
 0x373   :  { %v2132_v19 = vpop.eup %2131 }
 0x374   :  { %v399_v20 = vmul.f32 %v2132_v19, %v2130_v6  ;;  %v2101_v19 = vld [vmem:[%s3000_s4] ss:$0 sm:$0xff]  ;;  %s3004_s4 = sld [smem:[#allocation24_spill]] }
 0x376   :  { %2011 = vmatmul.msk.f32.vlgmr.msra.gmra.mxu1 %vm191_vm1, %v399_v20 }
 0x37e   :  { %2019 = vmatmul.msk.f32.vlgmr.msrb.gmra.mxu1 %vm191_vm1, %v540_v62 }
 0x3aa   :  { %v2608_v27 = vpop.f32.mrf.mxu0 }
 0x3b9   :  { %v2611_v31 = vpop.f32.mrf.mxu0 }
 0x3c1   :  { %v700_v32 = vpop.f32.mrf.mxu0 }
 0x3c2   :  { %v731_v33 = vmul.f32 0.35355338, %v700_v32 }
 0x3c4   :  { %v733_v34 = vsel %vm191_vm1, %v731_v33, -inf }
 0x3c5   :  { %v571_v21 = vpop.xlane.xlu2 %570 }
 0x3c6   :  { %v575_v22 = vsub.f32 %v567_v16, %v571_v21 }
 0x3c8   :  { %v577_v23 = vmul.f32 1.442695, %v575_v22 }
 0x3ca   :  { %2133 = vpow2.f32 %v577_v23  ;;  %v476_v14 = vpop.f32.mrf.mxu2 }
 0x3cb   :  { %v506_v17 = vadd.f32 %v2608_v27, %v476_v14 }
 0x3d0   :  { %v2134_v24 = vpop.eup %2133 }
 0x3d1   :  { %v581_v25 = vsel %vm191_vm1, %v2134_v24, 0.0 }
 0x3d2   :  { %582 = vadd.xlane.f32.xlu1 %v581_v25 }
 0x3eb   :  { %591 = vrot.lane.b32.xlu1 %v2527_v8, %s2978_s8 }
 0x3f3   :  { %v449_v26 = vpop.f32.mrf.mxu1 }
 0x3f4   :  { %2013 = vmatmul.msk.f32.gmra.mxu2 %vm191_vm1, %v449_v26  ;;  %v2344_v26 = vmov 32.0  }
 0x3fb   :  { %v564_v28 = vpop.f32.mrf.mxu1 }
 0x3fc   :  { %v568_v29 = vmul.f32 0.35355338, %v564_v28 }
 0x3fe   :  { %v572_v30 = vsel %vm191_vm1, %v568_v29, -inf }
 0x3ff   :  { %573 = vmax.xlane.f32.xlu0 %v572_v30 }
 0x413   :  { %755 = vrot.lane.b32.xlu0 %v2527_v8, %s2974_s1 }
 0x415   :  { %734 = vmax.xlane.f32.xlu1 %v733_v34 }
 0x445   :  { %v583_v35 = vpop.xlane.xlu1 %582 }
 0x446   :  { %2135 = vrcp.f32 %v583_v35 }
 0x44c   :  { %v2136_v36 = vpop.eup %2135 }
 0x44d   :  { %v589_v38 = vmul.f32 %v2136_v36, %v2134_v24 }
 0x45d   :  { %v592_v39 = vpop.permute.xlu1 %591 }
 0x45e   :  { %612 = vmatpush.msra.mxu3 %v592_v39 }
 0x45f   :  { %2020 = vmatmul.msk.f32.vlgmr.msra.gmra.mxu3 %vm191_vm1, %v589_v38 }
 0x460   :  { %2026 = vmatpush.xpose.msk.msrb.mxu3 %vm191_vm1, %v706_v37 }
 0x464   :  { %829 = vmatpush.msra.mxu3 %v807_v3 }
 0x467   :  { %2027 = vmatmul.msk.f32.vlgmr.msrb.gmra.mxu3 %vm191_vm1, %v704_v40 }
 0x472   :  { %v574_v41 = vpop.xlane.xlu0 %573 }
 0x473   :  { %v576_v42 = vsub.f32 %v568_v29, %v574_v41 }
 0x475   :  { %v579_v8 = vmul.f32 1.442695, %v576_v42 }
 0x477   :  { %2137 = vpow2.f32 %v579_v8  ;;  %v479_v15 = vpop.f32.mrf.mxu2 }
 0x478   :  { %v509_v39 = vadd.f32 %v2611_v31, %v479_v15  ;;  %v911_v31 = vld [vmem:[%s3001_s7 + $0x8] sm:$0xff] }
 0x47d   :  { %v2138_v43 = vpop.eup %2137 }
 0x47e   :  { %v584_v44 = vsel %vm191_vm1, %v2138_v43, 0.0 }
 0x47f   :  { %585 = vadd.xlane.f32.xlu2 %v584_v44 }
 0x485   :  { %v756_v60 = vpop.permute.xlu0 %755 }
 0x488   :  { %v735_v45 = vpop.xlane.xlu1 %734 }
 0x489   :  { %v739_v46 = vsub.f32 %v731_v33, %v735_v45  ;;  %v913_v45 = vld [vmem:[%s3001_s7 + $0x18] sm:$0xff] }
 0x48b   :  { %v741_v47 = vmul.f32 1.442695, %v739_v46  ;;  %v912_v46 = vld [vmem:[%s3001_s7 + $0x10] sm:$0xff] }
 0x48d   :  { %2139 = vpow2.f32 %v741_v47 }
 0x493   :  { %v2140_v48 = vpop.eup %2139 }
 0x494   :  { %v745_v49 = vsel %vm191_vm1, %v2140_v48, 0.0 }
 0x495   :  { %746 = vadd.xlane.f32.xlu2 %v745_v49 }
 0x4ad   :  { %617 = vrot.lane.b32.xlu2 %v2533_v10, %s2978_s8  ;;  %s3005_s8 = sld [smem:[#allocation23_spill]] }
 0x4b3   :  { %v2104_v14 = vld [vmem:[%s3005_s8] ss:$0 sm:$0xff] }
 0x4e2   :  { %v614_v51 = vpop.f32.mrf.mxu3 }
 0x4e3   :  { %2022 = vmatmul.msk.f32.vlgmr.msrb.gmra.mxu2 %vm191_vm1, %v614_v51 }
 0x4ea   :  { %v728_v52 = vpop.f32.mrf.mxu3 }
 0x4eb   :  { %v732_v53 = vmul.f32 0.35355338, %v728_v52 }
 0x4ed   :  { %v736_v54 = vsel %vm191_vm1, %v732_v53, -inf }
 0x4ee   :  { %737 = vmax.xlane.f32.xlu1 %v736_v54 }
 0x4f2   :  { %v586_v55 = vpop.xlane.xlu2 %585 }
 0x4f3   :  { %2141 = vrcp.f32 %v586_v55 }
 0x4f9   :  { %v2142_v57 = vpop.eup %2141 }
 0x4fa   :  { %v590_v58 = vmul.f32 %v2142_v57, %v2138_v43 }
 0x507   :  { %781 = vrot.lane.b32.xlu1 %v2533_v10, %s2974_s1  ;;  %s3002_s1 = sld [smem:[#allocation20_spill]] }
 0x508   :  { %v747_v56 = vpop.xlane.xlu2 %746 }
 0x509   :  { %2143 = vrcp.f32 %v747_v56 }
 0x50d   :  { %v2102_v56 = vld [vmem:[%s3002_s1] ss:$0 sm:$0xff]  ;;  %s3012_s1 = smov 40  }
 0x50f   :  { %v2144_v61 = vpop.eup %2143 }
 0x510   :  { %v618_v59 = vpop.permute.xlu2 %617  ;;  %v753_v62 = vmul.f32 %v2144_v61, %v2140_v48 }
 0x511   :  { %638 = vmatpush.msra.mxu1 %v618_v59  ;;  %v2103_v59 = vld [vmem:[%s3003_s6] ss:$0 sm:$0xff] }
 0x512   :  { %2021 = vmatmul.msk.f32.vlgmr.msra.gmra.mxu1 %vm191_vm1, %v590_v58 }
 0x513   :  { %776 = vmatpush.msrb.mxu1 %v756_v60 }
 0x515   :  { %936 = vmatpush.msra.mxu1 %v913_v45 }
 0x517   :  { %937 = vmatpush.msra.mxu1 %v912_v46 }
 0x519   :  { %938 = vmatpush.msra.mxu1 %v911_v31 }
 0x51a   :  { %2028 = vmatmul.msk.f32.vlgmr.msrb.gmra.mxu1 %vm191_vm1, %v753_v62  ;;  %v956_v62 = vld [vmem:[%s3004_s4 + $0x38] sm:$0xff] }
 0x51b   :  { %976 = vmatpush.msra.mxu2 %v956_v62  ;;  %v2107_v62 = vld [vmem:[%s2952_s12] ss:$0 sm:$0xff]  ;;  %s3008_s12 = smov 112  }
 0x561   :  { %v738_v63 = vpop.xlane.xlu1 %737 }
 0x562   :  { %v740_v0 = vsub.f32 %v732_v53, %v738_v63  ;;  %v955_v63 = vld [vmem:[%s3004_s4 + $0x30] sm:$0xff] }
 0x563   :  { %977 = vmatpush.msra.mxu2 %v955_v63 }
 0x564   :  { %v743_v1 = vmul.f32 1.442695, %v740_v0  ;;  %v954_v0 = vld [vmem:[%s3004_s4 + $0x28] sm:$0xff] }
 0x565   :  { %978 = vmatpush.msra.mxu2 %v954_v0 }
 0x566   :  { %2145 = vpow2.f32 %v743_v1  ;;  %v667_v16 = vpop.f32.mrf.mxu2  ;;  %v953_v1 = vld [vmem:[%s3004_s4 + $0x20] sm:$0xff] }
 0x567   :  { %v673_v18 = vadd.f32 %v667_v16, %v506_v17  ;;  %979 = vmatpush.msra.mxu2 %v953_v1 }
 0x56c   :  { %v2146_v2 = vpop.eup %2145 }
 0x56d   :  { %v748_v10 = vsel %vm191_vm1, %v2146_v2, 0.0 }
 0x56e   :  { %749 = vadd.xlane.f32.xlu2 %v748_v10 }
 0x579   :  { %v782_v6 = vpop.permute.xlu1 %781 }
 0x57a   :  { %802 = vmatpush.msrb.mxu0 %v782_v6 }
 0x58f   :  { %v640_v7 = vpop.f32.mrf.mxu1 }
 0x590   :  { %2023 = vmatmul.msk.f32.gmra.mxu2 %vm191_vm1, %v640_v7 }
 0x597   :  { %v778_v9 = vpop.f32.mrf.mxu1 }
 0x598   :  { %2030 = vmatmul.msk.f32.vlgmr.msra.gmra.mxu3 %vm191_vm1, %v778_v9 }
 0x5e1   :  { %v750_v11 = vpop.xlane.xlu2 %749 }
 0x5e2   :  { %2147 = vrcp.f32 %v750_v11  ;;  %v951_v11 = vld [vmem:[%s3004_s4 + $0x10] sm:$0xff] }
 0x5e3   :  { %2149 = vrcp.f32 %v2344_v26 }
 0x5e8   :  { %v2148_v12 = vpop.eup %2147 }
 0x5e9   :  { %v754_v13 = vmul.f32 %v2148_v12, %v2146_v2  ;;  %v2150_v28 = vpop.eup %2149  ;;  %v952_v2 = vld [vmem:[%s3004_s4 + $0x18] sm:$0xff]  ;;  %v950_v12 = vld [vmem:[%s3004_s4 + $0x8] sm:$0xff] }
 0x5ea   :  { %v856_v27 = vmul.f32 32.0, %v2150_v28  ;;  %vm860_vm2 = vweird.f32 %v2150_v28  ;;  %980 = vmatpush.msra.mxu2 %v952_v2 }
 0x5eb   :  { %2029 = vmatmul.msk.f32.vlgmr.msrb.gmra.mxu0 %vm191_vm1, %v754_v13  ;;  %v949_v13 = vld [vmem:[%s3004_s4] sm:$0xff] }
 0x5ec   :  { %v857_v29 = vsub.f32 1.0, %v856_v27  ;;  %981 = vmatpush.msra.mxu2 %v951_v11 }
 0x5ee   :  { %v858_v30 = vmul.f32 %v2150_v28, %v857_v29  ;;  %982 = vmatpush.msra.mxu2 %v950_v12 }
 0x5f0   :  { %v859_v32 = vadd.f32 %v2150_v28, %v858_v30  ;;  %983 = vmatpush.msra.mxu2 %v949_v13 }
 0x5f2   :  { %v2646_v33 = vsel %vm860_vm2, %v2150_v28, %v859_v32  ;;  %v2105_v32 = vld [vmem:[%s3006_s0] ss:$0 sm:$0xff]  ;;  %s3007_s0 = sld [smem:[#allocation26_spill]] }
 0x613   :  { %v670_v38 = vpop.f32.mrf.mxu2 }
 0x614   :  { %v674_v40 = vadd.f32 %v670_v38, %v509_v39 }
 0x61b   :  { %v831_v20 = vpop.f32.mrf.mxu3 }
 0x61c   :  { %v837_v21 = vadd.f32 %v831_v20, %v673_v18 }
 0x61e   :  { %v843_v22 = vadd.f32 %v2101_v19, %v837_v21 }
 0x620   :  { %v845_v23 = vadd.f32 %v843_v22, %v2519_v4 }
 0x622   :  { %v849_v24 = vsel %vm158_vm0, %v845_v23, 0.0 }
 0x623   :  { %850 = vadd.xlane.f32.xlu0 %v849_v24 }
 0x668   :  { %v804_v25 = vpop.f32.mrf.mxu0 }
 0x669   :  { %2031 = vmatmul.msk.f32.gmra.mxu3 %vm191_vm1, %v804_v25 }
 0x696   :  { %v851_v34 = vpop.xlane.xlu0 %850 }
 0x697   :  { %v862_v35 = vmul.f32 %v2646_v33, %v851_v34 }
 0x699   :  { %v864_v4 = vsub.f32 %v845_v23, %v862_v35 }
 0x69b   :  { %v866_v36 = vmul.f32 %v864_v4, %v864_v4 }
 0x69d   :  { %v868_v37 = vsel %vm158_vm0, %v866_v36, 0.0 }
 0x69e   :  { %869 = vadd.xlane.f32.xlu1 %v868_v37 }
 0x6ec   :  { %v834_v41 = vpop.f32.mrf.mxu3 }
 0x6ed   :  { %v838_v42 = vadd.f32 %v834_v41, %v674_v40 }
 0x6ef   :  { %v844_v8 = vadd.f32 %v2101_v19, %v838_v42 }
 0x6f1   :  { %v846_v43 = vadd.f32 %v844_v8, %v2523_v5  ;;  %v910_v5 = vld [vmem:[%s3001_s7] sm:$0xff]  ;;  %s3013_s7 = smov 8  }
 0x6f2   :  { %939 = vmatpush.msra.mxu1 %v910_v5  ;;  %v1052_v5 = vld [vmem:[%s2953_s13 + $0x18] sm:$0xff] }
 0x6f3   :  { %v852_v44 = vsel %vm158_vm0, %v846_v43, 0.0  ;;  %1075 = vmatpush.msra.mxu0 %v1052_v5 }
 0x6f4   :  { %853 = vadd.xlane.f32.xlu2 %v852_v44 }
 0x711   :  { %v870_v47 = vpop.xlane.xlu1 %869 }
 0x712   :  { %v874_v48 = vmul.f32 %v870_v47, %v2646_v33  ;;  %v1051_v47 = vld [vmem:[%s2953_s13 + $0x10] sm:$0xff] }
 0x713   :  { %1076 = vmatpush.msra.mxu0 %v1051_v47 }
 0x714   :  { %v876_v49 = vadd.f32 1e-05, %v874_v48  ;;  %v1050_v48 = vld [vmem:[%s2953_s13 + $0x8] sm:$0xff] }
 0x715   :  { %1077 = vmatpush.msra.mxu0 %v1050_v48 }
 0x716   :  { %2151 = vrsqrt.f32 %v876_v49  ;;  %vm884_vm4 = vweird.f32 %v876_v49 }
 0x71c   :  { %v2152_v50 = vpop.eup %2151 }
 0x71d   :  { %v879_v51 = vmul.f32 %v2152_v50, %v876_v49  ;;  %vm885_vm3 = vweird.f32 %v2152_v50  ;;  %v1049_v49 = vld [vmem:[%s2953_s13] sm:$0xff] }
 0x71e   :  { %vm886_vm5 = vmor %vm884_vm4, %vm885_vm3  ;;  %1078 = vmatpush.msra.mxu0 %v1049_v49 }
 0x71f   :  { %v880_v52 = vmul.f32 %v2152_v50, %v879_v51 }
 0x721   :  { %v881_v53 = vmul.f32 0.5, %v880_v52 }
 0x723   :  { %v882_v54 = vsub.f32 1.5, %v881_v53 }
 0x725   :  { %v883_v55 = vmul.f32 %v2152_v50, %v882_v54 }
 0x727   :  { %v887_v57 = vsel %vm886_vm5, %v2152_v50, %v883_v55 }
 0x728   :  { %v898_v58 = vmul.f32 %v887_v57, %v864_v4 }
 0x72a   :  { %v903_v60 = vmul.f32 %v2102_v56, %v898_v58 }
 0x72c   :  { %v908_v61 = vadd.f32 %v2103_v59, %v903_v60 }
 0x72e   :  { %2032 = vmatmul.msk.f32.vlgmr.msra.gmra.mxu1 %vm158_vm0, %v908_v61 }
 0x767   :  { %v854_v10 = vpop.xlane.xlu2 %853 }
 0x768   :  { %v863_v3 = vmul.f32 %v2646_v33, %v854_v10 }
 0x76a   :  { %v865_v6 = vsub.f32 %v846_v43, %v863_v3 }
 0x76c   :  { %v867_v7 = vmul.f32 %v865_v6, %v865_v6 }
 0x76e   :  { %v871_v9 = vsel %vm158_vm0, %v867_v7, 0.0  ;;  %v2108_v7 = vld [vmem:[%s2954_s14] ss:$0 sm:$0xff] }
 0x76f   :  { %872 = vadd.xlane.f32.xlu2 %v871_v9 }
 0x7ab   :  { %v941_v15 = vpop.f32.mrf.mxu1 }
 0x7ac   :  { %v942_v16 = vadd.f32 %v2104_v14, %v941_v15 }
 0x7ae   :  { %v947_v17 = vmax.f32 %v942_v16, 0.0 }
 0x7b0   :  { %2034 = vmatmul.msk.f32.vlgmr.msra.gmra.mxu2 %vm961_vm6, %v947_v17 }
 0x7e2   :  { %v873_v18 = vpop.xlane.xlu2 %872 }
 0x7e3   :  { %v875_v19 = vmul.f32 %v873_v18, %v2646_v33 }
 0x7e5   :  { %v877_v20 = vadd.f32 1e-05, %v875_v19 }
 0x7e7   :  { %2153 = vrsqrt.f32 %v877_v20  ;;  %vm894_vm8 = vweird.f32 %v877_v20 }
 0x7ed   :  { %v2154_v21 = vpop.eup %2153 }
 0x7ee   :  { %v889_v22 = vmul.f32 %v2154_v21, %v877_v20  ;;  %vm895_vm7 = vweird.f32 %v2154_v21 }
 0x7ef   :  { %vm896_vm9 = vmor %vm894_vm8, %vm895_vm7 }
 0x7f0   :  { %v890_v23 = vmul.f32 %v2154_v21, %v889_v22 }
 0x7f2   :  { %v891_v24 = vmul.f32 0.5, %v890_v23 }
 0x7f4   :  { %v892_v25 = vsub.f32 1.5, %v891_v24 }
 0x7f6   :  { %v893_v26 = vmul.f32 %v2154_v21, %v892_v25 }
 0x7f8   :  { %v897_v28 = vsel %vm896_vm9, %v2154_v21, %v893_v26 }
 0x7f9   :  { %v899_v27 = vmul.f32 %v897_v28, %v865_v6 }
 0x7fb   :  { %v904_v29 = vmul.f32 %v2102_v56, %v899_v27 }
 0x7fd   :  { %v909_v30 = vadd.f32 %v2103_v59, %v904_v29  ;;  %v2106_v59 = vld [vmem:[%s3007_s0] ss:$0 sm:$0xff] }
 0x7ff   :  { %2033 = vmatmul.msk.f32.gmra.mxu1 %vm158_vm0, %v909_v30 }
 0x833   :  { %v985_v34 = vpop.f32.mrf.mxu2 }
 0x834   :  { %v986_v35 = vadd.f32 %v2105_v32, %v985_v34 }
 0x836   :  { %v991_v4 = vadd.f32 %v986_v35, %v908_v61 }
 0x838   :  { %v995_v36 = vsel %vm158_vm0, %v991_v4, 0.0 }
 0x839   :  { %996 = vadd.xlane.f32.xlu2 %v995_v36 }
 0x87c   :  { %v944_v37 = vpop.f32.mrf.mxu1 }
 0x87d   :  { %v945_v38 = vadd.f32 %v2104_v14, %v944_v37 }
 0x87f   :  { %v948_v39 = vmax.f32 %v945_v38, 0.0 }
 0x881   :  { %2035 = vmatmul.msk.f32.gmra.mxu2 %vm961_vm6, %v948_v39 }
 0x8ac   :  { %v997_v40 = vpop.xlane.xlu2 %996 }
 0x8ad   :  { %v1001_v41 = vmul.f32 %v997_v40, %v2646_v33 }
 0x8af   :  { %v1003_v42 = vsub.f32 %v991_v4, %v1001_v41 }
 0x8b1   :  { %v1005_v8 = vmul.f32 %v1003_v42, %v1003_v42 }
 0x8b3   :  { %v1007_v43 = vsel %vm158_vm0, %v1005_v8, 0.0 }
 0x8b4   :  { %1008 = vadd.xlane.f32.xlu0 %v1007_v43 }
 0x904   :  { %v988_v44 = vpop.f32.mrf.mxu2 }
 0x905   :  { %v989_v45 = vadd.f32 %v2105_v32, %v988_v44 }
 0x907   :  { %v992_v46 = vadd.f32 %v989_v45, %v909_v30 }
 0x909   :  { %v998_v31 = vsel %vm158_vm0, %v992_v46, 0.0 }
 0x90a   :  { %999 = vadd.xlane.f32.xlu2 %v998_v31 }
 0x927   :  { %v1009_v50 = vpop.xlane.xlu0 %1008 }
 0x928   :  { %v1013_v51 = vmul.f32 %v1009_v50, %v2646_v33 }
 0x92a   :  { %v1015_v52 = vadd.f32 1e-05, %v1013_v51 }
 0x92c   :  { %2155 = vrsqrt.f32 %v1015_v52  ;;  %vm1023_vm11 = vweird.f32 %v1015_v52 }
 0x932   :  { %v2156_v53 = vpop.eup %2155 }
 0x933   :  { %v1018_v54 = vmul.f32 %v2156_v53, %v1015_v52  ;;  %vm1024_vm10 = vweird.f32 %v2156_v53 }
 0x934   :  { %vm1025_vm12 = vmor %vm1023_vm11, %vm1024_vm10 }
 0x935   :  { %v1019_v55 = vmul.f32 %v2156_v53, %v1018_v54 }
 0x937   :  { %v1020_v56 = vmul.f32 0.5, %v1019_v55 }
 0x939   :  { %v1021_v57 = vsub.f32 1.5, %v1020_v56 }
 0x93b   :  { %v1022_v58 = vmul.f32 %v2156_v53, %v1021_v57 }
 0x93d   :  { %v1026_v60 = vsel %vm1025_vm12, %v2156_v53, %v1022_v58 }
 0x93e   :  { %v1037_v61 = vmul.f32 %v1026_v60, %v1003_v42 }
 0x940   :  { %v1042_v63 = vmul.f32 %v2106_v59, %v1037_v61 }
 0x942   :  { %v2732_v0 = vadd.f32 %v2107_v62, %v1042_v63 }
 0x944   :  { %2036 = vmatmul.msk.f32.vlgmr.msra.gmra.mxu0 %vm158_vm0, %v2732_v0 }
 0x97d   :  { %v1000_v1 = vpop.xlane.xlu2 %999 }
 0x97e   :  { %v1002_v2 = vmul.f32 %v1000_v1, %v2646_v33 }
 0x980   :  { %v1004_v10 = vsub.f32 %v992_v46, %v1002_v2 }
 0x982   :  { %v1006_v3 = vmul.f32 %v1004_v10, %v1004_v10 }
 0x984   :  { %v1010_v6 = vsel %vm158_vm0, %v1006_v3, 0.0  ;;  %v1349_v3 = vld [vmem:[%s2955_s15 + $0x8] sm:$0xff] }
 0x985   :  { %1011 = vadd.xlane.f32.xlu0 %v1010_v6 }
 0x9c1   :  { %v1080_v9 = vpop.f32.mrf.mxu0 }
 0x9c2   :  { %v2741_v11 = vadd.f32 %v2108_v7, %v1080_v9 }
 0x9c4   :  { %1219 = vrot.lane.b32.xlu2 %v2741_v11, %s2333_s9  ;;  %1087 = vrot.lane.b32.xlu1 %v2741_v11, %s2334_s28 }
 0x9c5   :  { %1217 = vrot.lane.b32.xlu0 %v2741_v11, %s2335_s30 }
 0x9f8   :  { %v1012_v12 = vpop.xlane.xlu0 %1011 }
 0x9f9   :  { %v1014_v13 = vmul.f32 %v1012_v12, %v2646_v33 }
 0x9fb   :  { %v1016_v14 = vadd.f32 1e-05, %v1014_v13 }
 0x9fd   :  { %2157 = vrsqrt.f32 %v1016_v14  ;;  %vm1033_vm14 = vweird.f32 %v1016_v14 }
 0xa03   :  { %v2158_v15 = vpop.eup %2157 }
 0xa04   :  { %v1028_v16 = vmul.f32 %v2158_v15, %v1016_v14  ;;  %vm1034_vm13 = vweird.f32 %v2158_v15 }
 0xa05   :  { %vm1035_vm15 = vmor %vm1033_vm14, %vm1034_vm13 }
 0xa06   :  { %v1029_v17 = vmul.f32 %v2158_v15, %v1028_v16 }
 0xa08   :  { %v1030_v18 = vmul.f32 0.5, %v1029_v17 }
 0xa0a   :  { %v1031_v19 = vsub.f32 1.5, %v1030_v18 }
 0xa0c   :  { %v1032_v20 = vmul.f32 %v2158_v15, %v1031_v19 }
 0xa0e   :  { %v1036_v21 = vsel %vm1035_vm15, %v2158_v15, %v1032_v20 }
 0xa0f   :  { %v1038_v22 = vmul.f32 %v1036_v21, %v1004_v10  ;;  %v1216_v10 = vld [vmem:[%s2955_s15] sm:$0xff] }
 0xa11   :  { %v1043_v23 = vmul.f32 %v2106_v59, %v1038_v22 }
 0xa13   :  { %v2750_v24 = vadd.f32 %v2107_v62, %v1043_v23 }
 0xa15   :  { %2037 = vmatmul.msk.f32.gmra.mxu0 %vm158_vm0, %v2750_v24 }
 0xa1e   :  { %v1220_v26 = vpop.permute.xlu2 %1219 }
 0xa36   :  { %v1088_v25 = vpop.permute.xlu1 %1087 }
 0xa37   :  { %2038 = vmatpush.xpose.msk.msrb.mxu3 %vm191_vm1, %v1088_v25  ;;  %v1218_v28 = vpop.permute.xlu0 %1217 }
 0xa3a   :  { %2039 = vmatmul.msk.f32.vlgmr.msrb.gmra.mxu3 %vm191_vm1, %v2741_v11 }
 0xa3b   :  { %2044 = vmatpush.xpose.msk.msra.mxu3 %vm191_vm1, %v1220_v26 }
 0xa3f   :  { %1371 = vmatpush.msrb.mxu3 %v1349_v3 }
 0xa42   :  { %2045 = vmatmul.msk.f32.vlgmr.msra.gmra.mxu3 %vm191_vm1, %v1218_v28 }
 0xa92   :  { %v1083_v27 = vpop.f32.mrf.mxu0 }
 0xa93   :  { %v2759_v29 = vadd.f32 %v2108_v7, %v1083_v27 }
 0xa95   :  { %1114 = vrot.lane.b32.xlu0 %v2759_v29, %s2334_s28 }
 0xa9d   :  { %1297 = vrot.lane.b32.xlu0 %v2741_v11, %s2339_s19 }
 0xabd   :  { %v1110_v30 = vpop.f32.mrf.mxu3 }
 0xabe   :  { %v1140_v32 = vmul.f32 0.35355338, %v1110_v30 }
 0xac0   :  { %v1142_v34 = vsel %vm191_vm1, %v1140_v32, -inf }
 0xac1   :  { %1143 = vmax.xlane.f32.xlu2 %v1142_v34 }
 0xac5   :  { %v1242_v35 = vpop.f32.mrf.mxu3 }
 0xac6   :  { %v1273_v4 = vmul.f32 0.35355338, %v1242_v35 }
 0xac8   :  { %v1275_v36 = vsel %vm191_vm1, %v1273_v4, -inf }
 0xac9   :  { %1276 = vmax.xlane.f32.xlu1 %v1275_v36 }
 0xad9   :  { %1247 = vrot.lane.b32.xlu2 %v2759_v29, %s2333_s9 }
 0xae2   :  { %1164 = vrot.lane.b32.xlu1 %v2741_v11, %s2336_s5 }
 0xaea   :  { %1410 = vrot.lane.b32.xlu1 %v2741_v11, %s2338_s10 }
 0xb07   :  { %v1115_v37 = vpop.permute.xlu0 %1114 }
 0xb08   :  { %2040 = vmatpush.xpose.msk.msrb.mxu1 %vm191_vm1, %v1115_v37 }
 0xb0b   :  { %2041 = vmatmul.msk.f32.vlgmr.msrb.gmra.mxu1 %vm191_vm1, %v2759_v29 }
 0xb0f   :  { %v1298_v47 = vpop.permute.xlu0 %1297 }
 0xb34   :  { %v1144_v38 = vpop.xlane.xlu2 %1143 }
 0xb35   :  { %v1148_v39 = vsub.f32 %v1140_v32, %v1144_v38 }
 0xb37   :  { %v1150_v40 = vmul.f32 1.442695, %v1148_v39 }
 0xb39   :  { %2159 = vpow2.f32 %v1150_v40 }
 0xb3c   :  { %v1277_v41 = vpop.xlane.xlu1 %1276  ;;  %v1248_v42 = vpop.permute.xlu2 %1247 }
 0xb3d   :  { %v1281_v8 = vsub.f32 %v1273_v4, %v1277_v41  ;;  %2046 = vmatpush.xpose.msk.msra.mxu1 %vm191_vm1, %v1248_v42 }
 0xb3f   :  { %v2160_v43 = vpop.eup %2159  ;;  %v1283_v44 = vmul.f32 1.442695, %v1281_v8 }
 0xb40   :  { %v1154_v45 = vsel %vm191_vm1, %v2160_v43, 0.0 }
 0xb41   :  { %2161 = vpow2.f32 %v1283_v44  ;;  %1155 = vadd.xlane.f32.xlu0 %v1154_v45  ;;  %1400 = vmatpush.msrb.mxu1 %v1216_v10 }
 0xb47   :  { %v2162_v46 = vpop.eup %2161 }
 0xb48   :  { %v1287_v31 = vsel %vm191_vm1, %v2162_v46, 0.0 }
 0xb49   :  { %1288 = vadd.xlane.f32.xlu2 %v1287_v31  ;;  %v1540_v31 = vld [vmem:[%s2955_s15 + $0x10] sm:$0xff] }
 0xb4a   :  { %1562 = vmatpush.msra.mxu3 %v1540_v31 }
 0xb54   :  { %v1165_v5 = vpop.permute.xlu1 %1164 }
 0xb55   :  { %1185 = vmatpush.msrb.mxu2 %v1165_v5  ;;  %1245 = vrot.lane.b32.xlu0 %v2759_v29, %s2335_s30 }
 0xb57   :  { %1318 = vmatpush.msra.mxu2 %v1298_v47 }
 0xb5c   :  { %v1411_v55 = vpop.permute.xlu1 %1410 }
 0xb61   :  { %1408 = vrot.lane.b32.xlu2 %v2741_v11, %s3008_s12 }
 0xb69   :  { %1190 = vrot.lane.b32.xlu2 %v2759_v29, %s2336_s5  ;;  %s3009_s5 = smov 72  }
 0xb88   :  { %v1137_v48 = vpop.f32.mrf.mxu1 }
 0xb89   :  { %v1141_v49 = vmul.f32 0.35355338, %v1137_v48 }
 0xb8b   :  { %v1145_v50 = vsel %vm191_vm1, %v1141_v49, -inf }
 0xb8c   :  { %1146 = vmax.xlane.f32.xlu0 %v1145_v50 }
 0xbb4   :  { %v1156_v51 = vpop.xlane.xlu0 %1155 }
 0xbb5   :  { %2163 = vrcp.f32 %v1156_v51 }
 0xbbb   :  { %v2164_v52 = vpop.eup %2163 }
 0xbbc   :  { %v1162_v53 = vmul.f32 %v2164_v52, %v2160_v43  ;;  %v1289_v54 = vpop.xlane.xlu2 %1288 }
 0xbbd   :  { %2165 = vrcp.f32 %v1289_v54 }
 0xbbe   :  { %2042 = vmatmul.msk.f32.vlgmr.msrb.gmra.mxu2 %vm191_vm1, %v1162_v53 }
 0xbbf   :  { %2054 = vmatpush.xpose.msk.msrb.mxu2 %vm191_vm1, %v1411_v55 }
 0xbc3   :  { %v2166_v56 = vpop.eup %2165 }
 0xbc4   :  { %v1295_v57 = vmul.f32 %v2166_v56, %v2162_v46  ;;  %v1409_v58 = vpop.permute.xlu2 %1408 }
 0xbc6   :  { %2048 = vmatmul.msk.f32.vlgmr.msra.gmra.mxu2 %vm191_vm1, %v1295_v57 }
 0xbc7   :  { %v1246_v59 = vpop.permute.xlu0 %1245 }
 0xbc8   :  { %2047 = vmatmul.msk.f32.vlgmr.msra.gmra.mxu1 %vm191_vm1, %v1246_v59 }
 0xbcc   :  { %v1191_v60 = vpop.permute.xlu2 %1190 }
 0xbcd   :  { %1211 = vmatpush.msrb.mxu0 %v1191_v60 }
 0xbce   :  { %2055 = vmatmul.msk.f32.vlgmr.msrb.gmra.mxu2 %vm191_vm1, %v1409_v58 }
 0xbff   :  { %v1147_v61 = vpop.xlane.xlu0 %1146 }
 0xc00   :  { %v1149_v62 = vsub.f32 %v1141_v49, %v1147_v61 }
 0xc02   :  { %v1152_v63 = vmul.f32 1.442695, %v1149_v62 }
 0xc04   :  { %2167 = vpow2.f32 %v1152_v63 }
 0xc0a   :  { %v2168_v1 = vpop.eup %2167 }
 0xc0b   :  { %v1157_v2 = vsel %vm191_vm1, %v2168_v1, 0.0 }
 0xc0c   :  { %1158 = vadd.xlane.f32.xlu1 %v1157_v2 }
 0xc25   :  { %1436 = vrot.lane.b32.xlu1 %v2759_v29, %s3008_s12  ;;  %s3014_s12 = smov 128  }
 0xc41   :  { %v1187_v6 = vpop.f32.mrf.mxu2 }
 0xc42   :  { %2052 = vmatmul.msk.f32.vlgmr.msrb.gmra.mxu1 %vm191_vm1, %v1187_v6 }
 0xc45   :  { %v1270_v7 = vpop.f32.mrf.mxu1 }
 0xc46   :  { %v1274_v9 = vmul.f32 0.35355338, %v1270_v7 }
 0xc48   :  { %v1278_v12 = vsel %vm191_vm1, %v1274_v9, -inf }
 0xc49   :  { %1279 = vmax.xlane.f32.xlu2 %v1278_v12  ;;  %v1320_v13 = vpop.f32.mrf.mxu2 }
 0xc4a   :  { %2050 = vmatmul.msk.f32.vlgmr.msrb.gmra.mxu3 %vm191_vm1, %v1320_v13 }
 0xc51   :  { %v1433_v14 = vpop.f32.mrf.mxu2 }
 0xc52   :  { %v1464_v15 = vmul.f32 0.35355338, %v1433_v14 }
 0xc54   :  { %v1466_v16 = vsel %vm191_vm1, %v1464_v15, -inf }
 0xc55   :  { %1467 = vmax.xlane.f32.xlu0 %v1466_v16 }
 0xc61   :  { %1438 = vrot.lane.b32.xlu2 %v2759_v29, %s2338_s10 }
 0xc69   :  { %1602 = vrot.lane.b32.xlu2 %v2759_v29, %s3009_s5  ;;  %1323 = vrot.lane.b32.xlu0 %v2759_v29, %s2339_s19 }
 0xc71   :  { %1488 = vrot.lane.b32.xlu0 %v2741_v11, %s3010_s11 }
 0xc79   :  { %1574 = vrot.lane.b32.xlu0 %v2741_v11, %s3009_s5 }
 0xc7f   :  { %v1159_v17 = vpop.xlane.xlu1 %1158 }
 0xc80   :  { %2169 = vrcp.f32 %v1159_v17 }
 0xc81   :  { %1600 = vrot.lane.b32.xlu0 %v2759_v29, %s3011_s2 }
 0xc86   :  { %v2170_v18 = vpop.eup %2169 }
 0xc87   :  { %v1163_v19 = vmul.f32 %v2170_v18, %v2168_v1 }
 0xc89   :  { %2043 = vmatmul.msk.f32.vlgmr.msrb.gmra.mxu0 %vm191_vm1, %v1163_v19 }
 0xc97   :  { %v1437_v39 = vpop.permute.xlu1 %1436 }
 0xcbc   :  { %v1280_v20 = vpop.xlane.xlu2 %1279 }
 0xcbd   :  { %v1282_v21 = vsub.f32 %v1274_v9, %v1280_v20 }
 0xcbf   :  { %v1285_v22 = vmul.f32 1.442695, %v1282_v21  ;;  %v2834_v49 = vpop.f32.mrf.mxu1 }
 0xcc1   :  { %2171 = vpow2.f32 %v1285_v22 }
 0xcc4   :  { %v1439_v34 = vpop.permute.xlu2 %1438 }
 0xcc7   :  { %v2172_v23 = vpop.eup %2171 }
 0xcc8   :  { %v1468_v25 = vpop.xlane.xlu0 %1467  ;;  %v1290_v26 = vsel %vm191_vm1, %v2172_v23, 0.0 }
 0xcc9   :  { %v1472_v28 = vsub.f32 %v1464_v15, %v1468_v25  ;;  %1291 = vadd.xlane.f32.xlu1 %v1290_v26 }
 0xccb   :  { %v1474_v27 = vmul.f32 1.442695, %v1472_v28  ;;  %v1704_v28 = vld [vmem:[%s2955_s15 + $0x18] sm:$0xff] }
 0xccc   :  { %v1603_v36 = vpop.permute.xlu2 %1602 }
 0xccd   :  { %2173 = vpow2.f32 %v1474_v27 }
 0xcd3   :  { %v2174_v30 = vpop.eup %2173 }
 0xcd4   :  { %v1478_v32 = vsel %vm191_vm1, %v2174_v30, 0.0 }
 0xcd5   :  { %1479 = vadd.xlane.f32.xlu1 %v1478_v32  ;;  %v1373_v32 = vpop.f32.mrf.mxu3 }
 0xcdb   :  { %v1324_v35 = vpop.permute.xlu0 %1323 }
 0xcdc   :  { %1344 = vmatpush.msra.mxu0 %v1324_v35 }
 0xcde   :  { %2056 = vmatpush.xpose.msk.msrb.mxu0 %vm191_vm1, %v1439_v34 }
 0xce3   :  { %v1489_v4 = vpop.permute.xlu0 %1488 }
 0xce4   :  { %1509 = vmatpush.msra.mxu2 %v1489_v4  ;;  %v1403_v4 = vadd.f32 %v2834_v49, %v1373_v32 }
 0xce6   :  { %2064 = vmatpush.xpose.msk.msrb.mxu2 %vm191_vm1, %v1603_v36 }
 0xceb   :  { %v1575_v37 = vpop.permute.xlu0 %1574 }
 0xcec   :  { %2062 = vmatpush.xpose.msk.msra.mxu1 %vm191_vm1, %v1575_v37  ;;  %v2109_v37 = vld [vmem:[%s2956_s16] ss:$0 sm:$0xff] }
 0xcee   :  { %1572 = vrot.lane.b32.xlu1 %v2741_v11, %s3011_s2 }
 0xcf3   :  { %v1601_v45 = vpop.permute.xlu0 %1600 }
 0xd06   :  { %v1213_v38 = vpop.f32.mrf.mxu0 }
 0xd07   :  { %2053 = vmatmul.msk.f32.gmra.mxu1 %vm191_vm1, %v1213_v38 }
 0xd3c   :  { %v1292_v40 = vpop.xlane.xlu1 %1291 }
 0xd3d   :  { %2175 = vrcp.f32 %v1292_v40 }
 0xd43   :  { %v2176_v41 = vpop.eup %2175 }
 0xd44   :  { %v1296_v42 = vmul.f32 %v2176_v41, %v2172_v23 }
 0xd46   :  { %2049 = vmatmul.msk.f32.vlgmr.msra.gmra.mxu0 %vm191_vm1, %v1296_v42 }
 0xd48   :  { %v1480_v8 = vpop.xlane.xlu1 %1479 }
 0xd49   :  { %2177 = vrcp.f32 %v1480_v8 }
 0xd4e   :  { %2057 = vmatmul.msk.f32.vlgmr.msrb.gmra.mxu0 %vm191_vm1, %v1437_v39 }
 0xd4f   :  { %v2178_v43 = vpop.eup %2177 }
 0xd50   :  { %v1486_v44 = vmul.f32 %v2178_v43, %v2174_v30 }
 0xd52   :  { %2058 = vmatmul.msk.f32.vlgmr.msra.gmra.mxu2 %vm191_vm1, %v1486_v44 }
 0xd53   :  { %1726 = vmatpush.msra.mxu2 %v1704_v28 }
 0xd5a   :  { %2065 = vmatmul.msk.f32.vlgmr.msrb.gmra.mxu2 %vm191_vm1, %v1601_v45 }
 0xd60   :  { %v1573_v46 = vpop.permute.xlu1 %1572 }
 0xd61   :  { %2063 = vmatmul.msk.f32.vlgmr.msra.gmra.mxu1 %vm191_vm1, %v1573_v46 }
 0xd84   :  { %v2837_v52 = vpop.f32.mrf.mxu1 }
 0xdc3   :  { %v1346_v5 = vpop.f32.mrf.mxu0 }
 0xdc4   :  { %2051 = vmatmul.msk.f32.gmra.mxu3 %vm191_vm1, %v1346_v5 }
 0xdcb   :  { %v1461_v47 = vpop.f32.mrf.mxu0 }
 0xdcc   :  { %v1465_v48 = vmul.f32 0.35355338, %v1461_v47 }
 0xdce   :  { %v1469_v50 = vsel %vm191_vm1, %v1465_v48, -inf }
 0xdcf   :  { %1470 = vmax.xlane.f32.xlu2 %v1469_v50 }
 0xdd5   :  { %v1511_v51 = vpop.f32.mrf.mxu2 }
 0xdd6   :  { %2060 = vmatmul.msk.f32.vlgmr.msra.gmra.mxu3 %vm191_vm1, %v1511_v51 }
 0xddd   :  { %v1625_v53 = vpop.f32.mrf.mxu2 }
 0xdde   :  { %v1629_v54 = vmul.f32 0.35355338, %v1625_v53  ;;  %v1597_v55 = vpop.f32.mrf.mxu1 }
 0xddf   :  { %v1628_v56 = vmul.f32 0.35355338, %v1597_v55 }
 0xde0   :  { %v1633_v57 = vsel %vm191_vm1, %v1629_v54, -inf }
 0xde1   :  { %1634 = vmax.xlane.f32.xlu0 %v1633_v57  ;;  %v1630_v58 = vsel %vm191_vm1, %v1628_v56, -inf  ;;  %v1802_v57 = vld [vmem:[#allocation7 + $0x10] sm:$0xff] }
 0xde2   :  { %1631 = vmax.xlane.f32.xlu1 %v1630_v58  ;;  %v1801_v58 = vld [vmem:[#allocation7 + $0x8] sm:$0xff] }
 0xdf5   :  { %1514 = vrot.lane.b32.xlu0 %v2759_v29, %s3010_s11 }
 0xe42   :  { %v1471_v59 = vpop.xlane.xlu2 %1470 }
 0xe43   :  { %v1473_v60 = vsub.f32 %v1465_v48, %v1471_v59  ;;  %v1800_v59 = vld [vmem:[#allocation7] sm:$0xff] }
 0xe45   :  { %v1476_v61 = vmul.f32 1.442695, %v1473_v60 }
 0xe47   :  { %2179 = vpow2.f32 %v1476_v61  ;;  %v1376_v34 = vpop.f32.mrf.mxu3 }
 0xe48   :  { %v1406_v42 = vadd.f32 %v2837_v52, %v1376_v34 }
 0xe4d   :  { %v2180_v62 = vpop.eup %2179 }
 0xe4e   :  { %v1481_v63 = vsel %vm191_vm1, %v2180_v62, 0.0 }
 0xe4f   :  { %1482 = vadd.xlane.f32.xlu2 %v1481_v63  ;;  %v1846_v63 = vld [vmem:[%s2961_s21 + $0x38] sm:$0xff] }
 0xe50   :  { %1865 = vmatpush.msrb.mxu3 %v1846_v63 }
 0xe54   :  { %v1635_v1 = vpop.xlane.xlu0 %1634 }
 0xe55   :  { %v1637_v2 = vsub.f32 %v1629_v54, %v1635_v1  ;;  %v1632_v10 = vpop.xlane.xlu1 %1631  ;;  %v1845_v1 = vld [vmem:[%s2961_s21 + $0x30] sm:$0xff] }
 0xe56   :  { %v1636_v3 = vsub.f32 %v1628_v56, %v1632_v10  ;;  %1866 = vmatpush.msrb.mxu3 %v1845_v1 }
 0xe57   :  { %v1640_v6 = vmul.f32 1.442695, %v1637_v2  ;;  %v1844_v2 = vld [vmem:[%s2961_s21 + $0x28] sm:$0xff] }
 0xe58   :  { %v1638_v7 = vmul.f32 1.442695, %v1636_v3  ;;  %1867 = vmatpush.msrb.mxu3 %v1844_v2 }
 0xe59   :  { %2181 = vpow2.f32 %v1640_v6  ;;  %v1564_v35 = vpop.f32.mrf.mxu3  ;;  %v1843_v6 = vld [vmem:[%s2961_s21 + $0x20] sm:$0xff] }
 0xe5a   :  { %2183 = vpow2.f32 %v1638_v7  ;;  %v1570_v36 = vadd.f32 %v1564_v35, %v1403_v4  ;;  %1868 = vmatpush.msrb.mxu3 %v1843_v6  ;;  %v1841_v4 = vld [vmem:[%s2961_s21 + $0x10] sm:$0xff] }
 0xe5f   :  { %v2182_v9 = vpop.eup %2181 }
 0xe60   :  { %v2184_v12 = vpop.eup %2183  ;;  %v1645_v13 = vsel %vm191_vm1, %v2182_v9, 0.0 }
 0xe61   :  { %1646 = vadd.xlane.f32.xlu2 %v1645_v13  ;;  %v1642_v14 = vsel %vm191_vm1, %v2184_v12, 0.0 }
 0xe62   :  { %1643 = vadd.xlane.f32.xlu1 %v1642_v14 }
 0xe67   :  { %v1515_v15 = vpop.permute.xlu0 %1514 }
 0xe68   :  { %1535 = vmatpush.msra.mxu0 %v1515_v15 }
 0xe79   :  { %1678 = vrot.lane.b32.xlu2 %v2759_v29, %s3012_s1 }
 0xe7b   :  { %1652 = vrot.lane.b32.xlu1 %v2741_v11, %s3012_s1 }
 0xec2   :  { %v1483_v16 = vpop.xlane.xlu2 %1482 }
 0xec3   :  { %2185 = vrcp.f32 %v1483_v16 }
 0xec9   :  { %v2186_v17 = vpop.eup %2185 }
 0xeca   :  { %v1487_v18 = vmul.f32 %v2186_v17, %v2180_v62 }
 0xecc   :  { %2059 = vmatmul.msk.f32.vlgmr.msra.gmra.mxu0 %vm191_vm1, %v1487_v18 }
 0xed4   :  { %v1647_v19 = vpop.xlane.xlu2 %1646 }
 0xed5   :  { %2187 = vrcp.f32 %v1647_v19  ;;  %v1644_v23 = vpop.xlane.xlu1 %1643 }
 0xed6   :  { %2189 = vrcp.f32 %v1644_v23 }
 0xedb   :  { %v2188_v20 = vpop.eup %2187 }
 0xedc   :  { %v1651_v21 = vmul.f32 %v2188_v20, %v2182_v9  ;;  %v1679_v22 = vpop.permute.xlu2 %1678  ;;  %v2190_v29 = vpop.eup %2189  ;;  %v2110_v20 = vld [vmem:[%s2957_s17] ss:$0 sm:$0xff] }
 0xedd   :  { %1699 = vmatpush.msrb.mxu1 %v1679_v22  ;;  %v1650_v25 = vmul.f32 %v2190_v29, %v2184_v12  ;;  %v1842_v12 = vld [vmem:[%s2961_s21 + $0x18] sm:$0xff]  ;;  %v2111_v29 = vld [vmem:[%s2958_s18] ss:$0 sm:$0xff] }
 0xede   :  { %2067 = vmatmul.msk.f32.vlgmr.msrb.gmra.mxu1 %vm191_vm1, %v1651_v21  ;;  %1869 = vmatpush.msrb.mxu3 %v1842_v12 }
 0xee0   :  { %1870 = vmatpush.msrb.mxu3 %v1841_v4 }
 0xeed   :  { %v1653_v26 = vpop.permute.xlu1 %1652 }
 0xeee   :  { %1673 = vmatpush.msrb.mxu0 %v1653_v26 }
 0xeef   :  { %2066 = vmatmul.msk.f32.vlgmr.msrb.gmra.mxu0 %vm191_vm1, %v1650_v25 }
 0xf49   :  { %v1537_v11 = vpop.f32.mrf.mxu0 }
 0xf4a   :  { %2061 = vmatmul.msk.f32.gmra.mxu3 %vm191_vm1, %v1537_v11 }
 0xf5b   :  { %v1701_v30 = vpop.f32.mrf.mxu1 }
 0xf6c   :  { %v1675_v27 = vpop.f32.mrf.mxu0 }
 0xf6d   :  { %2068 = vmatmul.msk.f32.vlgmr.msra.gmra.mxu2 %vm191_vm1, %v1675_v27 }
 0xf75   :  { %2069 = vmatmul.msk.f32.gmra.mxu2 %vm191_vm1, %v1701_v30 }
 0xfcd   :  { %v1567_v41 = vpop.f32.mrf.mxu3 }
 0xfce   :  { %v1571_v43 = vadd.f32 %v1567_v41, %v1406_v42 }
 0xff0   :  { %v1728_v38 = vpop.f32.mrf.mxu2 }
 0xff1   :  { %v1734_v39 = vadd.f32 %v1728_v38, %v1570_v36  ;;  %v1840_v36 = vld [vmem:[%s2961_s21 + $0x8] sm:$0xff]  ;;  %v2112_v38 = vld [vmem:[%s2960_s20] ss:$0 sm:$0xff] }
 0xff2   :  { %1871 = vmatpush.msrb.mxu3 %v1840_v36 }
 0xff3   :  { %v1740_v40 = vadd.f32 %v2109_v37, %v1734_v39 }
 0xff5   :  { %v1742_v8 = vadd.f32 %v1740_v40, %v2732_v0 }
 0xff7   :  { %v1746_v44 = vsel %vm158_vm0, %v1742_v8, 0.0 }
 0xff8   :  { %1747 = vadd.xlane.f32.xlu0 %v1746_v44  ;;  %v1731_v45 = vpop.f32.mrf.mxu2  ;;  %v2113_v44 = vld [vmem:[%s2962_s22] ss:$0 sm:$0xff] }
 0xff9   :  { %v1735_v46 = vadd.f32 %v1731_v45, %v1571_v43 }
 0xffb   :  { %v1741_v31 = vadd.f32 %v2109_v37, %v1735_v46  ;;  %v1839_v37 = vld [vmem:[%s2961_s21] sm:$0xff] }
 0xffc   :  { %1872 = vmatpush.msrb.mxu3 %v1839_v37 }
 0xffd   :  { %v1743_v5 = vadd.f32 %v1741_v31, %v2750_v24  ;;  %v1803_v24 = vld [vmem:[#allocation7 + $0x18] sm:$0xff] }
 0xffe   :  { %1826 = vmatpush.msra.mxu0 %v1803_v24 }
 0xfff   :  { %v1749_v47 = vsel %vm158_vm0, %v1743_v5, 0.0 }
0x1000   :  { %1750 = vadd.xlane.f32.xlu1 %v1749_v47  ;;  %1827 = vmatpush.msra.mxu0 %v1802_v57 }
0x1002   :  { %1828 = vmatpush.msra.mxu0 %v1801_v58 }
0x1004   :  { %1829 = vmatpush.msra.mxu0 %v1800_v59  ;;  %v1941_v59 = vld [vmem:[#allocation8 + $0x18] sm:$0xff] }
0x1005   :  { %1964 = vmatpush.msra.mxu1 %v1941_v59 }
0x106b   :  { %v1748_v48 = vpop.xlane.xlu0 %1747 }
0x106c   :  { %v1752_v49 = vmul.f32 %v1748_v48, %v2646_v33 }
0x106e   :  { %v1754_v50 = vsub.f32 %v1742_v8, %v1752_v49 }
0x1070   :  { %v1756_v51 = vmul.f32 %v1754_v50, %v1754_v50 }
0x1072   :  { %v1758_v52 = vsel %vm158_vm0, %v1756_v51, 0.0 }
0x1073   :  { %1759 = vadd.xlane.f32.xlu2 %v1758_v52  ;;  %v1751_v0 = vpop.xlane.xlu1 %1750 }
0x1074   :  { %v1753_v53 = vmul.f32 %v1751_v0, %v2646_v33 }
0x1076   :  { %v1755_v54 = vsub.f32 %v1743_v5, %v1753_v53 }
0x1078   :  { %v1757_v55 = vmul.f32 %v1755_v54, %v1755_v54 }
0x107a   :  { %v1761_v56 = vsel %vm158_vm0, %v1757_v55, 0.0 }
0x107b   :  { %1762 = vadd.xlane.f32.xlu0 %v1761_v56 }
0x10e6   :  { %v1760_v60 = vpop.xlane.xlu2 %1759 }
0x10e7   :  { %v1764_v61 = vmul.f32 %v1760_v60, %v2646_v33  ;;  %v1940_v60 = vld [vmem:[#allocation8 + $0x10] sm:$0xff] }
0x10e8   :  { %1965 = vmatpush.msra.mxu1 %v1940_v60 }
0x10e9   :  { %v1766_v62 = vadd.f32 1e-05, %v1764_v61  ;;  %v1939_v61 = vld [vmem:[#allocation8 + $0x8] sm:$0xff] }
0x10ea   :  { %1966 = vmatpush.msra.mxu1 %v1939_v61 }
0x10eb   :  { %2191 = vrsqrt.f32 %v1766_v62  ;;  %vm1774_vm2 = vweird.f32 %v1766_v62 }
0x10ee   :  { %v1763_v10 = vpop.xlane.xlu0 %1762 }
0x10ef   :  { %v1765_v3 = vmul.f32 %v1763_v10, %v2646_v33 }
0x10f1   :  { %v2192_v7 = vpop.eup %2191  ;;  %v1767_v9 = vadd.f32 1e-05, %v1765_v3 }
0x10f2   :  { %v1769_v13 = vmul.f32 %v2192_v7, %v1766_v62  ;;  %vm1775_vm1 = vweird.f32 %v2192_v7  ;;  %v1938_v62 = vld [vmem:[#allocation8] sm:$0xff] }
0x10f3   :  { %2193 = vrsqrt.f32 %v1767_v9  ;;  %vm1776_vm3 = vmor %vm1774_vm2, %vm1775_vm1  ;;  %vm1784_vm5 = vweird.f32 %v1767_v9  ;;  %1967 = vmatpush.msra.mxu1 %v1938_v62 }
0x10f4   :  { %v1770_v14 = vmul.f32 %v2192_v7, %v1769_v13 }
0x10f6   :  { %v1771_v15 = vmul.f32 0.5, %v1770_v14 }
0x10f8   :  { %v1772_v16 = vsub.f32 1.5, %v1771_v15 }
0x10f9   :  { %v2194_v17 = vpop.eup %2193 }
0x10fa   :  { %v1773_v18 = vmul.f32 %v2192_v7, %v1772_v16  ;;  %v1779_v19 = vmul.f32 %v2194_v17, %v1767_v9  ;;  %vm1785_vm4 = vweird.f32 %v2194_v17 }
0x10fb   :  { %vm1786_vm7 = vmor %vm1784_vm5, %vm1785_vm4 }
0x10fc   :  { %v1777_v21 = vsel %vm1776_vm3, %v2192_v7, %v1773_v18  ;;  %v1780_v22 = vmul.f32 %v2194_v17, %v1779_v19  ;;  %v2114_v18 = vld [vmem:[%s2963_s23] ss:$0 sm:$0xff] }
0x10fd   :  { %v1788_v23 = vmul.f32 %v1777_v21, %v1754_v50  ;;  %v2115_v21 = vld [vmem:[%s2964_s24] ss:$0 sm:$0xff]  ;;  %s2345_s24 = smov [#allocation10]  }
0x10fe   :  { %v1781_v25 = vmul.f32 0.5, %v1780_v22  ;;  %s1981_s0 = sshll.u32 %s2345_s24, 4  ;;  %s1982_s0 = int_to_ptr.vmem [resolvable:$true] %s1981_s0 }
0x10ff   :  { %v1793_v26 = vmul.f32 %v2110_v20, %v1788_v23 }
0x1100   :  { %v1782_v11 = vsub.f32 1.5, %v1781_v25 }
0x1101   :  { %v1798_v28 = vadd.f32 %v2111_v29, %v1793_v26 }
0x1102   :  { %v1783_v27 = vmul.f32 %v2194_v17, %v1782_v11 }
0x1103   :  { %2070 = vmatmul.msk.f32.vlgmr.msra.gmra.mxu0 %vm158_vm0, %v1798_v28 }
0x1104   :  { %v1787_v30 = vsel %vm1786_vm7, %v2194_v17, %v1783_v27 }
0x1105   :  { %v1789_v32 = vmul.f32 %v1787_v30, %v1755_v54 }
0x1107   :  { %v1794_v34 = vmul.f32 %v2110_v20, %v1789_v32  ;;  %v2116_v32 = vld [vmem:[%s2966_s26] ss:$0 sm:$0xff] }
0x1109   :  { %v1799_v35 = vadd.f32 %v2111_v29, %v1794_v34 }
0x110b   :  { %2071 = vmatmul.msk.f32.gmra.mxu0 %vm158_vm0, %v1799_v35 }
0x1180   :  { %v1831_v39 = vpop.f32.mrf.mxu0 }
0x1181   :  { %v1832_v40 = vadd.f32 %v2112_v38, %v1831_v39 }
0x1183   :  { %v1837_v41 = vmax.f32 %v1832_v40, 0.0 }
0x1185   :  { %2072 = vmatmul.msk.f32.vlgmr.msrb.gmra.mxu3 %vm961_vm6, %v1837_v41 }
0x1188   :  { %v1834_v42 = vpop.f32.mrf.mxu0 }
0x1189   :  { %v1835_v8 = vadd.f32 %v2112_v38, %v1834_v42 }
0x118b   :  { %v1838_v43 = vmax.f32 %v1835_v8, 0.0 }
0x118d   :  { %2073 = vmatmul.msk.f32.gmra.mxu3 %vm961_vm6, %v1838_v43 }
0x1208   :  { %v1874_v45 = vpop.f32.mrf.mxu3 }
0x1209   :  { %v1875_v46 = vadd.f32 %v2113_v44, %v1874_v45 }
0x120b   :  { %v1880_v31 = vadd.f32 %v1875_v46, %v1798_v28 }
0x120d   :  { %v1884_v5 = vsel %vm158_vm0, %v1880_v31, 0.0 }
0x120e   :  { %1885 = vadd.xlane.f32.xlu0 %v1884_v5 }
0x1210   :  { %v1877_v47 = vpop.f32.mrf.mxu3 }
0x1211   :  { %v1878_v48 = vadd.f32 %v2113_v44, %v1877_v47 }
0x1213   :  { %v1881_v49 = vadd.f32 %v1878_v48, %v1799_v35 }
0x1215   :  { %v1887_v50 = vsel %vm158_vm0, %v1881_v49, 0.0 }
0x1216   :  { %1888 = vadd.xlane.f32.xlu1 %v1887_v50 }
0x1281   :  { %v1886_v51 = vpop.xlane.xlu0 %1885 }
0x1282   :  { %v1890_v52 = vmul.f32 %v1886_v51, %v2646_v33 }
0x1284   :  { %v1892_v0 = vsub.f32 %v1880_v31, %v1890_v52 }
0x1286   :  { %v1894_v53 = vmul.f32 %v1892_v0, %v1892_v0 }
0x1288   :  { %v1896_v54 = vsel %vm158_vm0, %v1894_v53, 0.0 }
0x1289   :  { %v1889_v55 = vpop.xlane.xlu1 %1888  ;;  %1897 = vadd.xlane.f32.xlu2 %v1896_v54 }
0x128a   :  { %v1891_v56 = vmul.f32 %v1889_v55, %v2646_v33 }
0x128c   :  { %v1893_v24 = vsub.f32 %v1881_v49, %v1891_v56 }
0x128e   :  { %v1895_v57 = vmul.f32 %v1893_v24, %v1893_v24 }
0x1290   :  { %v1899_v58 = vsel %vm158_vm0, %v1895_v57, 0.0 }
0x1291   :  { %1900 = vadd.xlane.f32.xlu0 %v1899_v58 }
0x12fc   :  { %v1898_v63 = vpop.xlane.xlu2 %1897 }
0x12fd   :  { %v1902_v1 = vmul.f32 %v1898_v63, %v2646_v33 }
0x12ff   :  { %v1904_v2 = vadd.f32 1e-05, %v1902_v1 }
0x1301   :  { %2195 = vrsqrt.f32 %v1904_v2  ;;  %vm1912_vm8 = vweird.f32 %v1904_v2 }
0x1304   :  { %v1901_v10 = vpop.xlane.xlu0 %1900 }
0x1305   :  { %v1903_v3 = vmul.f32 %v1901_v10, %v2646_v33 }
0x1307   :  { %v2196_v6 = vpop.eup %2195  ;;  %v1905_v7 = vadd.f32 1e-05, %v1903_v3 }
0x1308   :  { %v1907_v9 = vmul.f32 %v2196_v6, %v1904_v2  ;;  %vm1913_vm6 = vweird.f32 %v2196_v6 }
0x1309   :  { %2197 = vrsqrt.f32 %v1905_v7  ;;  %vm1914_vm9 = vmor %vm1912_vm8, %vm1913_vm6  ;;  %vm1922_vm11 = vweird.f32 %v1905_v7 }
0x130a   :  { %v1908_v12 = vmul.f32 %v2196_v6, %v1907_v9 }
0x130c   :  { %v1909_v13 = vmul.f32 0.5, %v1908_v12 }
0x130e   :  { %v1910_v14 = vsub.f32 1.5, %v1909_v13 }
0x130f   :  { %v2198_v15 = vpop.eup %2197 }
0x1310   :  { %v1911_v16 = vmul.f32 %v2196_v6, %v1910_v14  ;;  %v1917_v17 = vmul.f32 %v2198_v15, %v1905_v7  ;;  %vm1923_vm10 = vweird.f32 %v2198_v15 }
0x1311   :  { %vm1924_vm12 = vmor %vm1922_vm11, %vm1923_vm10 }
0x1312   :  { %v1915_v19 = vsel %vm1914_vm9, %v2196_v6, %v1911_v16  ;;  %v1918_v20 = vmul.f32 %v2198_v15, %v1917_v17 }
0x1313   :  { %v1926_v33 = vmul.f32 %v1915_v19, %v1892_v0 }
0x1314   :  { %v1919_v22 = vmul.f32 0.5, %v1918_v20 }
0x1315   :  { %v1931_v23 = vmul.f32 %v2114_v18, %v1926_v33 }
0x1316   :  { %v1920_v29 = vsub.f32 1.5, %v1919_v22 }
0x1317   :  { %v1936_v25 = vadd.f32 %v2115_v21, %v1931_v23 }
0x1318   :  { %v1921_v26 = vmul.f32 %v2198_v15, %v1920_v29 }
0x1319   :  { %2074 = vmatmul.msk.f32.vlgmr.msra.gmra.mxu1 %vm158_vm0, %v1936_v25 }
0x131a   :  { %v1925_v11 = vsel %vm1924_vm12, %v2198_v15, %v1921_v26 }
0x131b   :  { %v1927_v28 = vmul.f32 %v1925_v11, %v1893_v24 }
0x131d   :  { %v1932_v27 = vmul.f32 %v2114_v18, %v1927_v28 }
0x131f   :  { %v1937_v30 = vadd.f32 %v2115_v21, %v1932_v27 }
0x1321   :  { %2075 = vmatmul.msk.f32.gmra.mxu1 %vm158_vm0, %v1937_v30 }
0x1396   :  { %v1969_v34 = vpop.f32.mrf.mxu1 }
0x1397   :  { %v1970_v35 = vadd.f32 %v2116_v32, %v1969_v34 }
0x1399   :  { %1975 = vst [vmem:[#allocation10] sm:$0xff] %v1970_v35 }
0x139e   :  { %v1972_v4 = vpop.f32.mrf.mxu1 }
0x139f   :  { %v1973_v36 = vadd.f32 %v2116_v32, %v1972_v4 }
0x13a1   :  { %1976 = vst [vmem:[#allocation10 + $0x8] sm:$0xff] %v1973_v36 }
0x13a2   :  { %1989 = dma.vmem_to_hbm [thread:$0]  %s1982_s0, 256, %s1984_s3, [#allocation4], %s3014_s12, %s3014_s12, %s3013_s7  }
0x13a3   :  { %2325 = dma.done.wait [#allocation4], 256  }
0x13a4   :  { %2326 = vsyncadd [#allocation4], 4294967040 }
0x13a5   :  { %1994 = vsyncpa [#allocation3], 1 }
0x13a6   :  { %1995 = vsyncpa [#allocation6], 1 }
0x13a7   :  { %1996 = vsyncpa [#allocation9], 1 }
0x13a8   :  { %1997 = vsyncpa [#allocation4], 1 }

</bundles_post_ra>
